<compile_context>
chip_gen: v5e
topology: v5e:2x2
jax: 0.10.0
libtpu: 0.0.40
codegen_flags: <defaults>
</compile_context>

<pallas_src>
import jax
import jax.numpy as jnp
from jax.experimental import pallas as pl
from jax.experimental.pallas import tpu as pltpu

EPS = 1e-5  # torch/speechbrain LayerNorm default


def _round_up(x, m):
    return ((x + m - 1) // m) * m


def _make_csgu_kernel(K, PAD, T, C, C_pad, TT, HB):
    inv_c = 1.0 / float(C)

    def kernel(x2m_ref, x2h_ref, x1_ref, gamma_ref, beta_ref, w_ref, bias_ref,
               o_ref, win_ref):
        # grid = (batch, time-tile); this tile covers padded-time columns
        # [ti*TT, ti*TT + TT + HB) of its sequence.
        col0 = pl.program_id(1) * TT

        gamma = gamma_ref[...].astype(jnp.float32)   # (C_pad, 1)
        beta = beta_ref[...].astype(jnp.float32)     # (C_pad, 1)

        def ln_piece(piece, local_off, width):
            # piece: (C_pad, width) raw x2 slab.  Zero-padded channel rows
            # (>= C) contribute 0 to both the sum and the sum of squares, and
            # we divide by the true C, so the stats are exact.
            xs = piece.astype(jnp.float32)
            mean = jnp.sum(xs, axis=0, keepdims=True) * inv_c          # (1, w)
            xc = xs - mean
            var = jnp.sum(xc * xc, axis=0, keepdims=True) * inv_c
            xn = xc * jax.lax.rsqrt(var + EPS) * gamma + beta
            # Zero the conv 'same'-padding / round-up columns ONCE at full
            # width (LN of an all-zero column would otherwise leave `beta`,
            # which would corrupt edge outputs through the taps).
            col = (jax.lax.broadcasted_iota(jnp.int32, (C_pad, width), 1)
                   + (col0 + local_off))
            xn = jnp.where((col >= PAD) & (col < PAD + T), xn, 0.0)
            win_ref[:, local_off:local_off + width] = xn

        # normalized window (main tile + halo) in f32 scratch
        ln_piece(x2m_ref[0], 0, TT)
        ln_piece(x2h_ref[0], TT, HB)

        # ---- depthwise 'same' conv along time (lanes): static tap slices ----
        w = w_ref[...].astype(jnp.float32)           # (C_pad, K), loaded once
        acc = jnp.zeros((C_pad, TT), jnp.float32)
        for k in range(K):                           # static unroll
            if abs(k - PAD) >= T:
                continue                             # tap never touches real data
            acc = acc + win_ref[:, k:k + TT] * w[:, k:k + 1]
        acc = acc + bias_ref[...].astype(jnp.float32)

        # Gate multiply: x1 is loaded only here, after the tap loop.
        o_ref[0] = (acc * x1_ref[0].astype(jnp.float32)).astype(o_ref.dtype)

    return kernel


def csgu_forward(x, gamma, beta, conv_w, conv_b, kernel_size, max_time_tile=512):
    """x: (B, T, D) -> (B, T, D//2).

    conv_w: (K, C) depthwise taps (conv_w[k, c] == torch weight[c, 0, k]),
    conv_b: (C,).  gamma/beta: LayerNorm affine over the C channels.
    """
    B, T, D = x.shape
    assert D % 2 == 0, "input_size must be divisible by 2"
    C = D // 2
    K = int(kernel_size)
    assert K % 2 == 1, "only odd kernel_size supported"
    PAD = (K - 1) // 2

    # --- tile geometry: channels on sublanes, time on lanes ---
    C_pad = _round_up(C, 8)                          # sublane multiple
    HB = max(128, _round_up(2 * PAD, 128))           # halo width (lane multiple)
    TT = min(_round_up(max(T, 1), 128), max(int(max_time_tile), 128))
    TT = _round_up(max(TT, HB), HB)                  # halo block must tile TT
    nt = (T + TT - 1) // TT
    Tr = nt * TT
    step = TT // HB                                  # halo block index stride

    # --- repack to (B, C, time) and zero-pad (layout plumbing in the wrapper) ---
    x1_t = jnp.transpose(x[..., :C], (0, 2, 1))      # (B, C, T)  gate
    x2_t = jnp.transpose(x[..., C:], (0, 2, 1))      # (B, C, T)  LN + conv path
    x1_p = jnp.pad(x1_t, ((0, 0), (0, C_pad - C), (0, Tr - T)))
    x2_p = jnp.pad(x2_t, ((0, 0), (0, C_pad - C), (PAD, Tr + HB - PAD - T)))

    gamma_p = jnp.pad(jnp.reshape(gamma, (C, 1)), ((0, C_pad - C), (0, 0)))
    beta_p = jnp.pad(jnp.reshape(beta, (C, 1)), ((0, C_pad - C), (0, 0)))
    bias_p = jnp.pad(jnp.reshape(conv_b, (C, 1)), ((0, C_pad - C), (0, 0)))
    w_p = jnp.pad(jnp.transpose(conv_w), ((0, C_pad - C), (0, 0)))   # (C_pad, K)

    # Per-step VMEM estimate: double-buffered x2(main+halo)/x1/out tiles plus
    # the f32 normalized-window scratch.  Raise the scoped limit only if needed
    # (v5e/v6e have 128 MiB; stay well under v7x's 64 MiB physical).
    itemsize = jnp.dtype(x.dtype).itemsize
    est = 2 * C_pad * (3 * TT + HB) * itemsize + 4 * C_pad * (TT + HB)
    cp_kwargs = dict(dimension_semantics=("parallel", "parallel"))
    if est > 24 * 2**20:
        cp_kwargs["vmem_limit_bytes"] = int(min(est * 2, 56 * 2**20))

    out = pl.pallas_call(
        _make_csgu_kernel(K, PAD, T, C, C_pad, TT, HB),
        out_shape=jax.ShapeDtypeStruct((B, C_pad, Tr), x.dtype),
        grid=(B, nt),
        in_specs=[
            pl.BlockSpec((1, C_pad, TT), lambda b, t: (b, 0, t)),              # x2 main
            pl.BlockSpec((1, C_pad, HB), lambda b, t: (b, 0, (t + 1) * step)),  # x2 halo
            pl.BlockSpec((1, C_pad, TT), lambda b, t: (b, 0, t)),              # x1 gate
            pl.BlockSpec((C_pad, 1), lambda b, t: (0, 0)),                     # LN gamma
            pl.BlockSpec((C_pad, 1), lambda b, t: (0, 0)),                     # LN beta
            pl.BlockSpec((C_pad, K), lambda b, t: (0, 0)),                     # conv taps
            pl.BlockSpec((C_pad, 1), lambda b, t: (0, 0)),                     # conv bias
        ],
        out_specs=pl.BlockSpec((1, C_pad, TT), lambda b, t: (b, 0, t)),
        scratch_shapes=[pltpu.VMEM((C_pad, TT + HB), jnp.float32)],
        compiler_params=pltpu.CompilerParams(**cp_kwargs),
    )(x2_p, x2_p, x1_p, gamma_p, beta_p, w_p, bias_p)

    # strip channel/time padding and restore (B, T, C)
    return jnp.transpose(out[:, :C, :T], (0, 2, 1))


def csgu_reference(x, gamma, beta, conv_w, conv_b, kernel_size):
    """Pure-JAX reference for validation."""
    B, T, D = x.shape
    C = D // 2
    K = kernel_size
    PAD = (K - 1) // 2
    x1 = x[..., :C].astype(jnp.float32)
    x2 = x[..., C:].astype(jnp.float32)
    mean = jnp.mean(x2, axis=-1, keepdims=True)
    var = jnp.mean((x2 - mean) ** 2, axis=-1, keepdims=True)
    xn = (x2 - mean) / jnp.sqrt(var + EPS) * gamma + beta
    xp = jnp.pad(xn, ((0, 0), (PAD, PAD), (0, 0)))
    acc = jnp.broadcast_to(conv_b, (B, T, C)).astype(jnp.float32)
    for k in range(K):
        acc = acc + xp[:, k:k + T, :] * conv_w[k][None, None, :]
    return (acc * x1).astype(x.dtype)


if __name__ == "__main__":
    # Module config: input_size=32 -> n_channels=16, kernel_size=31 (default).
    B, T, D = 2, 16, 32
    C = D // 2
    K = 31

    key = jax.random.PRNGKey(0)
    kx, kw = jax.random.split(key)
    x = jax.random.normal(kx, (B, T, D), dtype=jnp.float32)

    # Deterministic parameter init (mirrors module __init__ shapes/values):
    gamma = jnp.ones((C,), jnp.float32)                        # LayerNorm weight
    beta = jnp.zeros((C,), jnp.float32)                        # LayerNorm bias
    conv_w = 0.1 * jax.random.normal(kw, (K, C), jnp.float32)  # depthwise taps ('normal' init)
    conv_b = jnp.ones((C,), jnp.float32)                       # conv bias init to ones

    out = csgu_forward(x, gamma, beta, conv_w, conv_b, K)
    out = jax.block_until_ready(out)

    ref = csgu_reference(x, gamma, beta, conv_w, conv_b, K)
    assert out.shape == (B, T, C), out.shape
    assert jnp.allclose(out, ref, atol=1e-4, rtol=1e-4), float(jnp.max(jnp.abs(out - ref)))

    print("KERNEL_OK")
</pallas_src>

<mosaic_0001>
module attributes {stable_mosaic.version = 11 : i64} {
  func.func @kernel(%arg0: i32, %arg1: i32, %arg2: memref<1x16x128xf32, #tpu.memory_space<vmem>>, %arg3: memref<1x16x128xf32, #tpu.memory_space<vmem>>, %arg4: memref<1x16x128xf32, #tpu.memory_space<vmem>>, %arg5: memref<16x1xf32, #tpu.memory_space<vmem>>, %arg6: memref<16x1xf32, #tpu.memory_space<vmem>>, %arg7: memref<16x31xf32, #tpu.memory_space<vmem>>, %arg8: memref<16x1xf32, #tpu.memory_space<vmem>>, %arg9: memref<1x16x128xf32, #tpu.memory_space<vmem>>, %arg10: memref<16x256xf32, #tpu.memory_space<vmem>>) attributes {dimension_semantics = [#tpu.dimension_semantics<parallel>, #tpu.dimension_semantics<parallel>], iteration_bounds = array<i64: 2, 1>, scalar_prefetch = 0 : i64, scratch_operands = 1 : i64, tpu.core_type = #tpu.core_type<tc>, window_params = [{transform_indices = @transform_0, window_bounds = array<i64: 1, 16, 128>}, {transform_indices = @transform_1, window_bounds = array<i64: 1, 16, 128>}, {transform_indices = @transform_2, window_bounds = array<i64: 1, 16, 128>}, {pipeline_mode = #tpu.pipeline_mode<synchronous>, transform_indices = @transform_3, window_bounds = array<i64: 16, 1>}, {pipeline_mode = #tpu.pipeline_mode<synchronous>, transform_indices = @transform_4, window_bounds = array<i64: 16, 1>}, {pipeline_mode = #tpu.pipeline_mode<synchronous>, transform_indices = @transform_5, window_bounds = array<i64: 16, 31>}, {pipeline_mode = #tpu.pipeline_mode<synchronous>, transform_indices = @transform_6, window_bounds = array<i64: 16, 1>}, {transform_indices = @transform_7, window_bounds = array<i64: 1, 16, 128>}]} {
    %c128_i32 = arith.constant 128 : i32
    %0 = arith.muli %arg1, %c128_i32 : i32
    %c0 = arith.constant 0 : index
    %c0_0 = arith.constant 0 : index
    %1 = vector.load %arg5[%c0, %c0_0] : memref<16x1xf32, #tpu.memory_space<vmem>>, vector<16x1xf32>
    %c0_1 = arith.constant 0 : index
    %c0_2 = arith.constant 0 : index
    %2 = vector.load %arg6[%c0_1, %c0_2] : memref<16x1xf32, #tpu.memory_space<vmem>>, vector<16x1xf32>
    %c0_3 = arith.constant 0 : index
    %c0_4 = arith.constant 0 : index
    %c0_5 = arith.constant 0 : index
    %3 = vector.load %arg2[%c0_3, %c0_4, %c0_5] : memref<1x16x128xf32, #tpu.memory_space<vmem>>, vector<1x16x128xf32>
    %4 = vector.shape_cast %3 : vector<1x16x128xf32> to vector<16x128xf32>
    %cst = arith.constant dense<0.000000e+00> : vector<128xf32>
    %5 = vector.multi_reduction <add>, %4, %cst [0] : vector<16x128xf32> to vector<128xf32>
    %6 = vector.shape_cast %5 : vector<128xf32> to vector<1x128xf32>
    %cst_6 = arith.constant 6.250000e-02 : f32
    %7 = vector.broadcast %cst_6 : f32 to vector<1x128xf32>
    %8 = arith.mulf %6, %7 : vector<1x128xf32>
    %9 = vector.broadcast %8 : vector<1x128xf32> to vector<16x128xf32>
    %10 = arith.subf %4, %9 : vector<16x128xf32>
    %11 = arith.mulf %10, %10 : vector<16x128xf32>
    %cst_7 = arith.constant dense<0.000000e+00> : vector<128xf32>
    %12 = vector.multi_reduction <add>, %11, %cst_7 [0] : vector<16x128xf32> to vector<128xf32>
    %13 = vector.shape_cast %12 : vector<128xf32> to vector<1x128xf32>
    %cst_8 = arith.constant 6.250000e-02 : f32
    %14 = vector.broadcast %cst_8 : f32 to vector<1x128xf32>
    %15 = arith.mulf %13, %14 : vector<1x128xf32>
    %cst_9 = arith.constant 9.99999974E-6 : f32
    %16 = vector.broadcast %cst_9 : f32 to vector<1x128xf32>
    %17 = arith.addf %15, %16 : vector<1x128xf32>
    %18 = math.rsqrt %17 : vector<1x128xf32>
    %19 = vector.broadcast %18 : vector<1x128xf32> to vector<16x128xf32>
    %20 = arith.mulf %10, %19 : vector<16x128xf32>
    %21 = vector.broadcast %1 : vector<16x1xf32> to vector<16x128xf32>
    %22 = arith.mulf %20, %21 : vector<16x128xf32>
    %23 = vector.broadcast %2 : vector<16x1xf32> to vector<16x128xf32>
    %24 = arith.addf %22, %23 : vector<16x128xf32>
    %25 = tpu.iota {dimensions = array<i32: 1>} : vector<16x128xi32>
    %c0_i32 = arith.constant 0 : i32
    %26 = arith.addi %0, %c0_i32 : i32
    %27 = vector.broadcast %26 : i32 to vector<16x128xi32>
    %28 = arith.addi %25, %27 : vector<16x128xi32>
    %c15_i32 = arith.constant 15 : i32
    %29 = vector.broadcast %c15_i32 : i32 to vector<16x128xi32>
    %30 = arith.cmpi sge, %28, %29 : vector<16x128xi32>
    %c31_i32 = arith.constant 31 : i32
    %31 = vector.broadcast %c31_i32 : i32 to vector<16x128xi32>
    %32 = arith.cmpi slt, %28, %31 : vector<16x128xi32>
    %33 = arith.andi %30, %32 : vector<16x128xi1>
    %cst_10 = arith.constant 0.000000e+00 : f32
    %34 = vector.broadcast %cst_10 : f32 to vector<16x128xf32>
    %35 = arith.select %33, %24, %34 : vector<16x128xi1>, vector<16x128xf32>
    %c0_11 = arith.constant 0 : index
    %c0_12 = arith.constant 0 : index
    %36 = vector.load %arg10[%c0_11, %c0_12] : memref<16x256xf32, #tpu.memory_space<vmem>>, vector<16x128xf32>
    tpu.vector_store %arg10[%c0_11, %c0_12], %35 {strides = array<i32>} : memref<16x256xf32, #tpu.memory_space<vmem>>, vector<16x128xf32>,
    %c0_13 = arith.constant 0 : index
    %c0_14 = arith.constant 0 : index
    %c0_15 = arith.constant 0 : index
    %37 = vector.load %arg3[%c0_13, %c0_14, %c0_15] : memref<1x16x128xf32, #tpu.memory_space<vmem>>, vector<1x16x128xf32>
    %38 = vector.shape_cast %37 : vector<1x16x128xf32> to vector<16x128xf32>
    %cst_16 = arith.constant dense<0.000000e+00> : vector<128xf32>
    %39 = vector.multi_reduction <add>, %38, %cst_16 [0] : vector<16x128xf32> to vector<128xf32>
    %40 = vector.shape_cast %39 : vector<128xf32> to vector<1x128xf32>
    %cst_17 = arith.constant 6.250000e-02 : f32
    %41 = vector.broadcast %cst_17 : f32 to vector<1x128xf32>
    %42 = arith.mulf %40, %41 : vector<1x128xf32>
    %43 = vector.broadcast %42 : vector<1x128xf32> to vector<16x128xf32>
    %44 = arith.subf %38, %43 : vector<16x128xf32>
    %45 = arith.mulf %44, %44 : vector<16x128xf32>
    %cst_18 = arith.constant dense<0.000000e+00> : vector<128xf32>
    %46 = vector.multi_reduction <add>, %45, %cst_18 [0] : vector<16x128xf32> to vector<128xf32>
    %47 = vector.shape_cast %46 : vector<128xf32> to vector<1x128xf32>
    %cst_19 = arith.constant 6.250000e-02 : f32
    %48 = vector.broadcast %cst_19 : f32 to vector<1x128xf32>
    %49 = arith.mulf %47, %48 : vector<1x128xf32>
    %cst_20 = arith.constant 9.99999974E-6 : f32
    %50 = vector.broadcast %cst_20 : f32 to vector<1x128xf32>
    %51 = arith.addf %49, %50 : vector<1x128xf32>
    %52 = math.rsqrt %51 : vector<1x128xf32>
    %53 = vector.broadcast %52 : vector<1x128xf32> to vector<16x128xf32>
    %54 = arith.mulf %44, %53 : vector<16x128xf32>
    %55 = vector.broadcast %1 : vector<16x1xf32> to vector<16x128xf32>
    %56 = arith.mulf %54, %55 : vector<16x128xf32>
    %57 = vector.broadcast %2 : vector<16x1xf32> to vector<16x128xf32>
    %58 = arith.addf %56, %57 : vector<16x128xf32>
    %59 = tpu.iota {dimensions = array<i32: 1>} : vector<16x128xi32>
    %c128_i32_21 = arith.constant 128 : i32
    %60 = arith.addi %0, %c128_i32_21 : i32
    %61 = vector.broadcast %60 : i32 to vector<16x128xi32>
    %62 = arith.addi %59, %61 : vector<16x128xi32>
    %c15_i32_22 = arith.constant 15 : i32
    %63 = vector.broadcast %c15_i32_22 : i32 to vector<16x128xi32>
    %64 = arith.cmpi sge, %62, %63 : vector<16x128xi32>
    %c31_i32_23 = arith.constant 31 : i32
    %65 = vector.broadcast %c31_i32_23 : i32 to vector<16x128xi32>
    %66 = arith.cmpi slt, %62, %65 : vector<16x128xi32>
    %67 = arith.andi %64, %66 : vector<16x128xi1>
    %cst_24 = arith.constant 0.000000e+00 : f32
    %68 = vector.broadcast %cst_24 : f32 to vector<16x128xf32>
    %69 = arith.select %67, %58, %68 : vector<16x128xi1>, vector<16x128xf32>
    %c0_25 = arith.constant 0 : index
    %c128 = arith.constant 128 : index
    %70 = vector.load %arg10[%c0_25, %c128] : memref<16x256xf32, #tpu.memory_space<vmem>>, vector<16x128xf32>
    tpu.vector_store %arg10[%c0_25, %c128], %69 {strides = array<i32>} : memref<16x256xf32, #tpu.memory_space<vmem>>, vector<16x128xf32>,
    %c0_26 = arith.constant 0 : index
    %c0_27 = arith.constant 0 : index
    %71 = vector.load %arg7[%c0_26, %c0_27] : memref<16x31xf32, #tpu.memory_space<vmem>>, vector<16x31xf32>
    %cst_28 = arith.constant 0.000000e+00 : f32
    %72 = vector.broadcast %cst_28 : f32 to vector<16x128xf32>
    %c0_29 = arith.constant 0 : index
    %c0_30 = arith.constant 0 : index
    %73 = vector.load %arg10[%c0_29, %c0_30] : memref<16x256xf32, #tpu.memory_space<vmem>>, vector<16x128xf32>
    %74 = vector.extract_strided_slice %71 {offsets = [0, 0], sizes = [16, 1], strides = [1, 1]} : vector<16x31xf32> to vector<16x1xf32>
    %75 = vector.broadcast %74 : vector<16x1xf32> to vector<16x128xf32>
    %76 = arith.mulf %73, %75 : vector<16x128xf32>
    %77 = arith.addf %72, %76 : vector<16x128xf32>
    %c0_31 = arith.constant 0 : index
    %c1 = arith.constant 1 : index
    %78 = vector.load %arg10[%c0_31, %c1] : memref<16x256xf32, #tpu.memory_space<vmem>>, vector<16x128xf32>
    %79 = vector.extract_strided_slice %71 {offsets = [0, 1], sizes = [16, 1], strides = [1, 1]} : vector<16x31xf32> to vector<16x1xf32>
    %80 = vector.broadcast %79 : vector<16x1xf32> to vector<16x128xf32>
    %81 = arith.mulf %78, %80 : vector<16x128xf32>
    %82 = arith.addf %77, %81 : vector<16x128xf32>
    %c0_32 = arith.constant 0 : index
    %c2 = arith.constant 2 : index
    %83 = vector.load %arg10[%c0_32, %c2] : memref<16x256xf32, #tpu.memory_space<vmem>>, vector<16x128xf32>
    %84 = vector.extract_strided_slice %71 {offsets = [0, 2], sizes = [16, 1], strides = [1, 1]} : vector<16x31xf32> to vector<16x1xf32>
    %85 = vector.broadcast %84 : vector<16x1xf32> to vector<16x128xf32>
    %86 = arith.mulf %83, %85 : vector<16x128xf32>
    %87 = arith.addf %82, %86 : vector<16x128xf32>
    %c0_33 = arith.constant 0 : index
    %c3 = arith.constant 3 : index
    %88 = vector.load %arg10[%c0_33, %c3] : memref<16x256xf32, #tpu.memory_space<vmem>>, vector<16x128xf32>
    %89 = vector.extract_strided_slice %71 {offsets = [0, 3], sizes = [16, 1], strides = [1, 1]} : vector<16x31xf32> to vector<16x1xf32>
    %90 = vector.broadcast %89 : vector<16x1xf32> to vector<16x128xf32>
    %91 = arith.mulf %88, %90 : vector<16x128xf32>
    %92 = arith.addf %87, %91 : vector<16x128xf32>
    %c0_34 = arith.constant 0 : index
    %c4 = arith.constant 4 : index
    %93 = vector.load %arg10[%c0_34, %c4] : memref<16x256xf32, #tpu.memory_space<vmem>>, vector<16x128xf32>
    %94 = vector.extract_strided_slice %71 {offsets = [0, 4], sizes = [16, 1], strides = [1, 1]} : vector<16x31xf32> to vector<16x1xf32>
    %95 = vector.broadcast %94 : vector<16x1xf32> to vector<16x128xf32>
    %96 = arith.mulf %93, %95 : vector<16x128xf32>
    %97 = arith.addf %92, %96 : vector<16x128xf32>
    %c0_35 = arith.constant 0 : index
    %c5 = arith.constant 5 : index
    %98 = vector.load %arg10[%c0_35, %c5] : memref<16x256xf32, #tpu.memory_space<vmem>>, vector<16x128xf32>
    %99 = vector.extract_strided_slice %71 {offsets = [0, 5], sizes = [16, 1], strides = [1, 1]} : vector<16x31xf32> to vector<16x1xf32>
    %100 = vector.broadcast %99 : vector<16x1xf32> to vector<16x128xf32>
    %101 = arith.mulf %98, %100 : vector<16x128xf32>
    %102 = arith.addf %97, %101 : vector<16x128xf32>
    %c0_36 = arith.constant 0 : index
    %c6 = arith.constant 6 : index
    %103 = vector.load %arg10[%c0_36, %c6] : memref<16x256xf32, #tpu.memory_space<vmem>>, vector<16x128xf32>
    %104 = vector.extract_strided_slice %71 {offsets = [0, 6], sizes = [16, 1], strides = [1, 1]} : vector<16x31xf32> to vector<16x1xf32>
    %105 = vector.broadcast %104 : vector<16x1xf32> to vector<16x128xf32>
    %106 = arith.mulf %103, %105 : vector<16x128xf32>
    %107 = arith.addf %102, %106 : vector<16x128xf32>
    %c0_37 = arith.constant 0 : index
    %c7 = arith.constant 7 : index
    %108 = vector.load %arg10[%c0_37, %c7] : memref<16x256xf32, #tpu.memory_space<vmem>>, vector<16x128xf32>
    %109 = vector.extract_strided_slice %71 {offsets = [0, 7], sizes = [16, 1], strides = [1, 1]} : vector<16x31xf32> to vector<16x1xf32>
    %110 = vector.broadcast %109 : vector<16x1xf32> to vector<16x128xf32>
    %111 = arith.mulf %108, %110 : vector<16x128xf32>
    %112 = arith.addf %107, %111 : vector<16x128xf32>
    %c0_38 = arith.constant 0 : index
    %c8 = arith.constant 8 : index
    %113 = vector.load %arg10[%c0_38, %c8] : memref<16x256xf32, #tpu.memory_space<vmem>>, vector<16x128xf32>
    %114 = vector.extract_strided_slice %71 {offsets = [0, 8], sizes = [16, 1], strides = [1, 1]} : vector<16x31xf32> to vector<16x1xf32>
    %115 = vector.broadcast %114 : vector<16x1xf32> to vector<16x128xf32>
    %116 = arith.mulf %113, %115 : vector<16x128xf32>
    %117 = arith.addf %112, %116 : vector<16x128xf32>
    %c0_39 = arith.constant 0 : index
    %c9 = arith.constant 9 : index
    %118 = vector.load %arg10[%c0_39, %c9] : memref<16x256xf32, #tpu.memory_space<vmem>>, vector<16x128xf32>
    %119 = vector.extract_strided_slice %71 {offsets = [0, 9], sizes = [16, 1], strides = [1, 1]} : vector<16x31xf32> to vector<16x1xf32>
    %120 = vector.broadcast %119 : vector<16x1xf32> to vector<16x128xf32>
    %121 = arith.mulf %118, %120 : vector<16x128xf32>
    %122 = arith.addf %117, %121 : vector<16x128xf32>
    %c0_40 = arith.constant 0 : index
    %c10 = arith.constant 10 : index
    %123 = vector.load %arg10[%c0_40, %c10] : memref<16x256xf32, #tpu.memory_space<vmem>>, vector<16x128xf32>
    %124 = vector.extract_strided_slice %71 {offsets = [0, 10], sizes = [16, 1], strides = [1, 1]} : vector<16x31xf32> to vector<16x1xf32>
    %125 = vector.broadcast %124 : vector<16x1xf32> to vector<16x128xf32>
    %126 = arith.mulf %123, %125 : vector<16x128xf32>
    %127 = arith.addf %122, %126 : vector<16x128xf32>
    %c0_41 = arith.constant 0 : index
    %c11 = arith.constant 11 : index
    %128 = vector.load %arg10[%c0_41, %c11] : memref<16x256xf32, #tpu.memory_space<vmem>>, vector<16x128xf32>
    %129 = vector.extract_strided_slice %71 {offsets = [0, 11], sizes = [16, 1], strides = [1, 1]} : vector<16x31xf32> to vector<16x1xf32>
    %130 = vector.broadcast %129 : vector<16x1xf32> to vector<16x128xf32>
    %131 = arith.mulf %128, %130 : vector<16x128xf32>
    %132 = arith.addf %127, %131 : vector<16x128xf32>
    %c0_42 = arith.constant 0 : index
    %c12 = arith.constant 12 : index
    %133 = vector.load %arg10[%c0_42, %c12] : memref<16x256xf32, #tpu.memory_space<vmem>>, vector<16x128xf32>
    %134 = vector.extract_strided_slice %71 {offsets = [0, 12], sizes = [16, 1], strides = [1, 1]} : vector<16x31xf32> to vector<16x1xf32>
    %135 = vector.broadcast %134 : vector<16x1xf32> to vector<16x128xf32>
    %136 = arith.mulf %133, %135 : vector<16x128xf32>
    %137 = arith.addf %132, %136 : vector<16x128xf32>
    %c0_43 = arith.constant 0 : index
    %c13 = arith.constant 13 : index
    %138 = vector.load %arg10[%c0_43, %c13] : memref<16x256xf32, #tpu.memory_space<vmem>>, vector<16x128xf32>
    %139 = vector.extract_strided_slice %71 {offsets = [0, 13], sizes = [16, 1], strides = [1, 1]} : vector<16x31xf32> to vector<16x1xf32>
    %140 = vector.broadcast %139 : vector<16x1xf32> to vector<16x128xf32>
    %141 = arith.mulf %138, %140 : vector<16x128xf32>
    %142 = arith.addf %137, %141 : vector<16x128xf32>
    %c0_44 = arith.constant 0 : index
    %c14 = arith.constant 14 : index
    %143 = vector.load %arg10[%c0_44, %c14] : memref<16x256xf32, #tpu.memory_space<vmem>>, vector<16x128xf32>
    %144 = vector.extract_strided_slice %71 {offsets = [0, 14], sizes = [16, 1], strides = [1, 1]} : vector<16x31xf32> to vector<16x1xf32>
    %145 = vector.broadcast %144 : vector<16x1xf32> to vector<16x128xf32>
    %146 = arith.mulf %143, %145 : vector<16x128xf32>
    %147 = arith.addf %142, %146 : vector<16x128xf32>
    %c0_45 = arith.constant 0 : index
    %c15 = arith.constant 15 : index
    %148 = vector.load %arg10[%c0_45, %c15] : memref<16x256xf32, #tpu.memory_space<vmem>>, vector<16x128xf32>
    %149 = vector.extract_strided_slice %71 {offsets = [0, 15], sizes = [16, 1], strides = [1, 1]} : vector<16x31xf32> to vector<16x1xf32>
    %150 = vector.broadcast %149 : vector<16x1xf32> to vector<16x128xf32>
    %151 = arith.mulf %148, %150 : vector<16x128xf32>
    %152 = arith.addf %147, %151 : vector<16x128xf32>
    %c0_46 = arith.constant 0 : index
    %c16 = arith.constant 16 : index
    %153 = vector.load %arg10[%c0_46, %c16] : memref<16x256xf32, #tpu.memory_space<vmem>>, vector<16x128xf32>
    %154 = vector.extract_strided_slice %71 {offsets = [0, 16], sizes = [16, 1], strides = [1, 1]} : vector<16x31xf32> to vector<16x1xf32>
    %155 = vector.broadcast %154 : vector<16x1xf32> to vector<16x128xf32>
    %156 = arith.mulf %153, %155 : vector<16x128xf32>
    %157 = arith.addf %152, %156 : vector<16x128xf32>
    %c0_47 = arith.constant 0 : index
    %c17 = arith.constant 17 : index
    %158 = vector.load %arg10[%c0_47, %c17] : memref<16x256xf32, #tpu.memory_space<vmem>>, vector<16x128xf32>
    %159 = vector.extract_strided_slice %71 {offsets = [0, 17], sizes = [16, 1], strides = [1, 1]} : vector<16x31xf32> to vector<16x1xf32>
    %160 = vector.broadcast %159 : vector<16x1xf32> to vector<16x128xf32>
    %161 = arith.mulf %158, %160 : vector<16x128xf32>
    %162 = arith.addf %157, %161 : vector<16x128xf32>
    %c0_48 = arith.constant 0 : index
    %c18 = arith.constant 18 : index
    %163 = vector.load %arg10[%c0_48, %c18] : memref<16x256xf32, #tpu.memory_space<vmem>>, vector<16x128xf32>
    %164 = vector.extract_strided_slice %71 {offsets = [0, 18], sizes = [16, 1], strides = [1, 1]} : vector<16x31xf32> to vector<16x1xf32>
    %165 = vector.broadcast %164 : vector<16x1xf32> to vector<16x128xf32>
    %166 = arith.mulf %163, %165 : vector<16x128xf32>
    %167 = arith.addf %162, %166 : vector<16x128xf32>
    %c0_49 = arith.constant 0 : index
    %c19 = arith.constant 19 : index
    %168 = vector.load %arg10[%c0_49, %c19] : memref<16x256xf32, #tpu.memory_space<vmem>>, vector<16x128xf32>
    %169 = vector.extract_strided_slice %71 {offsets = [0, 19], sizes = [16, 1], strides = [1, 1]} : vector<16x31xf32> to vector<16x1xf32>
    %170 = vector.broadcast %169 : vector<16x1xf32> to vector<16x128xf32>
    %171 = arith.mulf %168, %170 : vector<16x128xf32>
    %172 = arith.addf %167, %171 : vector<16x128xf32>
    %c0_50 = arith.constant 0 : index
    %c20 = arith.constant 20 : index
    %173 = vector.load %arg10[%c0_50, %c20] : memref<16x256xf32, #tpu.memory_space<vmem>>, vector<16x128xf32>
    %174 = vector.extract_strided_slice %71 {offsets = [0, 20], sizes = [16, 1], strides = [1, 1]} : vector<16x31xf32> to vector<16x1xf32>
    %175 = vector.broadcast %174 : vector<16x1xf32> to vector<16x128xf32>
    %176 = arith.mulf %173, %175 : vector<16x128xf32>
    %177 = arith.addf %172, %176 : vector<16x128xf32>
    %c0_51 = arith.constant 0 : index
    %c21 = arith.constant 21 : index
    %178 = vector.load %arg10[%c0_51, %c21] : memref<16x256xf32, #tpu.memory_space<vmem>>, vector<16x128xf32>
    %179 = vector.extract_strided_slice %71 {offsets = [0, 21], sizes = [16, 1], strides = [1, 1]} : vector<16x31xf32> to vector<16x1xf32>
    %180 = vector.broadcast %179 : vector<16x1xf32> to vector<16x128xf32>
    %181 = arith.mulf %178, %180 : vector<16x128xf32>
    %182 = arith.addf %177, %181 : vector<16x128xf32>
    %c0_52 = arith.constant 0 : index
    %c22 = arith.constant 22 : index
    %183 = vector.load %arg10[%c0_52, %c22] : memref<16x256xf32, #tpu.memory_space<vmem>>, vector<16x128xf32>
    %184 = vector.extract_strided_slice %71 {offsets = [0, 22], sizes = [16, 1], strides = [1, 1]} : vector<16x31xf32> to vector<16x1xf32>
    %185 = vector.broadcast %184 : vector<16x1xf32> to vector<16x128xf32>
    %186 = arith.mulf %183, %185 : vector<16x128xf32>
    %187 = arith.addf %182, %186 : vector<16x128xf32>
    %c0_53 = arith.constant 0 : index
    %c23 = arith.constant 23 : index
    %188 = vector.load %arg10[%c0_53, %c23] : memref<16x256xf32, #tpu.memory_space<vmem>>, vector<16x128xf32>
    %189 = vector.extract_strided_slice %71 {offsets = [0, 23], sizes = [16, 1], strides = [1, 1]} : vector<16x31xf32> to vector<16x1xf32>
    %190 = vector.broadcast %189 : vector<16x1xf32> to vector<16x128xf32>
    %191 = arith.mulf %188, %190 : vector<16x128xf32>
    %192 = arith.addf %187, %191 : vector<16x128xf32>
    %c0_54 = arith.constant 0 : index
    %c24 = arith.constant 24 : index
    %193 = vector.load %arg10[%c0_54, %c24] : memref<16x256xf32, #tpu.memory_space<vmem>>, vector<16x128xf32>
    %194 = vector.extract_strided_slice %71 {offsets = [0, 24], sizes = [16, 1], strides = [1, 1]} : vector<16x31xf32> to vector<16x1xf32>
    %195 = vector.broadcast %194 : vector<16x1xf32> to vector<16x128xf32>
    %196 = arith.mulf %193, %195 : vector<16x128xf32>
    %197 = arith.addf %192, %196 : vector<16x128xf32>
    %c0_55 = arith.constant 0 : index
    %c25 = arith.constant 25 : index
    %198 = vector.load %arg10[%c0_55, %c25] : memref<16x256xf32, #tpu.memory_space<vmem>>, vector<16x128xf32>
    %199 = vector.extract_strided_slice %71 {offsets = [0, 25], sizes = [16, 1], strides = [1, 1]} : vector<16x31xf32> to vector<16x1xf32>
    %200 = vector.broadcast %199 : vector<16x1xf32> to vector<16x128xf32>
    %201 = arith.mulf %198, %200 : vector<16x128xf32>
    %202 = arith.addf %197, %201 : vector<16x128xf32>
    %c0_56 = arith.constant 0 : index
    %c26 = arith.constant 26 : index
    %203 = vector.load %arg10[%c0_56, %c26] : memref<16x256xf32, #tpu.memory_space<vmem>>, vector<16x128xf32>
    %204 = vector.extract_strided_slice %71 {offsets = [0, 26], sizes = [16, 1], strides = [1, 1]} : vector<16x31xf32> to vector<16x1xf32>
    %205 = vector.broadcast %204 : vector<16x1xf32> to vector<16x128xf32>
    %206 = arith.mulf %203, %205 : vector<16x128xf32>
    %207 = arith.addf %202, %206 : vector<16x128xf32>
    %c0_57 = arith.constant 0 : index
    %c27 = arith.constant 27 : index
    %208 = vector.load %arg10[%c0_57, %c27] : memref<16x256xf32, #tpu.memory_space<vmem>>, vector<16x128xf32>
    %209 = vector.extract_strided_slice %71 {offsets = [0, 27], sizes = [16, 1], strides = [1, 1]} : vector<16x31xf32> to vector<16x1xf32>
    %210 = vector.broadcast %209 : vector<16x1xf32> to vector<16x128xf32>
    %211 = arith.mulf %208, %210 : vector<16x128xf32>
    %212 = arith.addf %207, %211 : vector<16x128xf32>
    %c0_58 = arith.constant 0 : index
    %c28 = arith.constant 28 : index
    %213 = vector.load %arg10[%c0_58, %c28] : memref<16x256xf32, #tpu.memory_space<vmem>>, vector<16x128xf32>
    %214 = vector.extract_strided_slice %71 {offsets = [0, 28], sizes = [16, 1], strides = [1, 1]} : vector<16x31xf32> to vector<16x1xf32>
    %215 = vector.broadcast %214 : vector<16x1xf32> to vector<16x128xf32>
    %216 = arith.mulf %213, %215 : vector<16x128xf32>
    %217 = arith.addf %212, %216 : vector<16x128xf32>
    %c0_59 = arith.constant 0 : index
    %c29 = arith.constant 29 : index
    %218 = vector.load %arg10[%c0_59, %c29] : memref<16x256xf32, #tpu.memory_space<vmem>>, vector<16x128xf32>
    %219 = vector.extract_strided_slice %71 {offsets = [0, 29], sizes = [16, 1], strides = [1, 1]} : vector<16x31xf32> to vector<16x1xf32>
    %220 = vector.broadcast %219 : vector<16x1xf32> to vector<16x128xf32>
    %221 = arith.mulf %218, %220 : vector<16x128xf32>
    %222 = arith.addf %217, %221 : vector<16x128xf32>
    %c0_60 = arith.constant 0 : index
    %c30 = arith.constant 30 : index
    %223 = vector.load %arg10[%c0_60, %c30] : memref<16x256xf32, #tpu.memory_space<vmem>>, vector<16x128xf32>
    %224 = vector.extract_strided_slice %71 {offsets = [0, 30], sizes = [16, 1], strides = [1, 1]} : vector<16x31xf32> to vector<16x1xf32>
    %225 = vector.broadcast %224 : vector<16x1xf32> to vector<16x128xf32>
    %226 = arith.mulf %223, %225 : vector<16x128xf32>
    %227 = arith.addf %222, %226 : vector<16x128xf32>
    %c0_61 = arith.constant 0 : index
    %c0_62 = arith.constant 0 : index
    %228 = vector.load %arg8[%c0_61, %c0_62] : memref<16x1xf32, #tpu.memory_space<vmem>>, vector<16x1xf32>
    %229 = vector.broadcast %228 : vector<16x1xf32> to vector<16x128xf32>
    %230 = arith.addf %227, %229 : vector<16x128xf32>
    %c0_63 = arith.constant 0 : index
    %c0_64 = arith.constant 0 : index
    %c0_65 = arith.constant 0 : index
    %231 = vector.load %arg4[%c0_63, %c0_64, %c0_65] : memref<1x16x128xf32, #tpu.memory_space<vmem>>, vector<1x16x128xf32>
    %232 = vector.shape_cast %231 : vector<1x16x128xf32> to vector<16x128xf32>
    %233 = arith.mulf %230, %232 : vector<16x128xf32>
    %c0_66 = arith.constant 0 : index
    %c0_67 = arith.constant 0 : index
    %c0_68 = arith.constant 0 : index
    %234 = vector.load %arg9[%c0_66, %c0_67, %c0_68] : memref<1x16x128xf32, #tpu.memory_space<vmem>>, vector<1x16x128xf32>
    %235 = vector.shape_cast %234 : vector<1x16x128xf32> to vector<16x128xf32>
    %236 = vector.shape_cast %233 : vector<16x128xf32> to vector<1x16x128xf32>
    tpu.vector_store %arg9[%c0_66, %c0_67, %c0_68], %236 {strides = array<i32>} : memref<1x16x128xf32, #tpu.memory_space<vmem>>, vector<1x16x128xf32>,
    return
  }
  func.func @transform_0(%arg0: i32, %arg1: i32) -> (i32, i32, i32) {
    %c0_i32 = arith.constant 0 : i32
    %c0_i32_0 = arith.constant 0 : i32
    return %arg0, %c0_i32, %arg1 : i32, i32, i32
  }
  func.func @transform_1(%arg0: i32, %arg1: i32) -> (i32, i32, i32) {
    %c1_i32 = arith.constant 1 : i32
    %0 = arith.addi %arg1, %c1_i32 : i32
    %c1_i32_0 = arith.constant 1 : i32
    %1 = arith.muli %0, %c1_i32_0 : i32
    %c0_i32 = arith.constant 0 : i32
    %c0_i32_1 = arith.constant 0 : i32
    return %arg0, %c0_i32, %1 : i32, i32, i32
  }
  func.func @transform_2(%arg0: i32, %arg1: i32) -> (i32, i32, i32) {
    %c0_i32 = arith.constant 0 : i32
    %c0_i32_0 = arith.constant 0 : i32
    return %arg0, %c0_i32, %arg1 : i32, i32, i32
  }
  func.func @transform_3(%arg0: i32, %arg1: i32) -> (i32, i32) {
    %c0_i32 = arith.constant 0 : i32
    %c0_i32_0 = arith.constant 0 : i32
    %c0_i32_1 = arith.constant 0 : i32
    return %c0_i32, %c0_i32_0 : i32, i32
  }
  func.func @transform_4(%arg0: i32, %arg1: i32) -> (i32, i32) {
    %c0_i32 = arith.constant 0 : i32
    %c0_i32_0 = arith.constant 0 : i32
    %c0_i32_1 = arith.constant 0 : i32
    return %c0_i32, %c0_i32_0 : i32, i32
  }
  func.func @transform_5(%arg0: i32, %arg1: i32) -> (i32, i32) {
    %c0_i32 = arith.constant 0 : i32
    %c0_i32_0 = arith.constant 0 : i32
    %c0_i32_1 = arith.constant 0 : i32
    return %c0_i32, %c0_i32_0 : i32, i32
  }
  func.func @transform_6(%arg0: i32, %arg1: i32) -> (i32, i32) {
    %c0_i32 = arith.constant 0 : i32
    %c0_i32_0 = arith.constant 0 : i32
    %c0_i32_1 = arith.constant 0 : i32
    return %c0_i32, %c0_i32_0 : i32, i32
  }
  func.func @transform_7(%arg0: i32, %arg1: i32) -> (i32, i32, i32) {
    %c0_i32 = arith.constant 0 : i32
    %c0_i32_0 = arith.constant 0 : i32
    return %arg0, %c0_i32, %arg1 : i32, i32, i32
  }
}

</mosaic_0001>

<bundles_post_ra>
// kernel: tpu_custom_call.1
= control target key start
LH: loop header
LB: loop body
LE: loop exit
PB: predicated region body
PF: predicated region fallthrough
CT: control target
= control target key end

     0   :  { %s2815_s0 = inlined_call_operand.hbm [shape: f32[2,16,256], index: 0, kind: input, shape index: {}]   ;;  %s2816_s1 = inlined_call_operand.hbm [shape: f32[2,16,256], index: 1, kind: input, shape index: {}]   ;;  %s2817_s2 = inlined_call_operand.vmem [shape: f32[2,16,128], index: 2, kind: input, shape index: {}]   ;;  %s2818_s3 = inlined_call_operand.vmem [shape: f32[16,1], index: 3, kind: input, shape index: {}]   ;;  %s2819_s4 = inlined_call_operand.vmem [shape: f32[16,1], index: 4, kind: input, shape index: {}]   ;;  %s2820_s5 = inlined_call_operand.vmem [shape: f32[16,31], index: 5, kind: input, shape index: {}]   ;;  %s2821_s6 = inlined_call_operand.vmem [shape: f32[16,1], index: 6, kind: input, shape index: {}]   ;;  %s2822_s7 = inlined_call_operand.hbm [shape: f32[2,16,128], index: 7, kind: output, shape index: {}]  }
   0x1   :  { %2831 = sst [smem:[#allocation17_spill]] %s2815_s0 }
   0x2   :  { %12 = vsyncpa [#allocation4], 0 }
   0x3   :  { %14 = vsyncpa [#allocation4 + $0x1], 0 }
   0x4   :  { %15 = vsyncpa [#allocation7], 0 }
   0x5   :  { %17 = vsyncpa [#allocation7 + $0x1], 0 }
   0x6   :  { %18 = vsyncpa [#allocation5], 0 }
   0x7   :  { %20 = vsyncpa [#allocation5 + $0x1], 0  ;;  %s2119_s24 = smov 0   ;;  %s2121_s25 = smov 0  }
   0x8   :  { %s2123_s26 = smov 0   ;;  %s2125_s27 = smov 0  }
   0x9   :  { %s2127_s28 = smov 0   ;;  %s2129_s29 = smov 0  }
   0xa LB: > { %2832 = sst [smem:[#allocation12_spill]] %s1999_s26  ;;  %s1638_s30 = sadd.s32 4294967295, %s2011_s29   ;;  %s2011_s29 = sphi %s2129_s29, %s26_s29   ;;  %s2007_s28 = sphi %s2127_s28, %s2851_s28   ;;  %s2003_s27 = sphi %s2125_s27, %s2850_s27   ;;  %s1999_s26 = sphi %s2123_s26, %s2849_s26   ;;  %s1995_s25 = sphi %s2121_s25, %s2853_s25   ;;  %s1991_s24 = sphi %s2119_s24, %s2852_s24  }
   0xb   : > { %2833 = sst [smem:[#allocation13_spill]] %s2007_s28  ;;  %s1639_s8 = sadd.s32 4294967294, %s2011_s29  }
   0xc   : > { %s38_s9 = sadd.s32 1, %s2007_s28  ;;  %s47_s10 = sadd.s32 1, %s1999_s26 }
   0xd   : > { %p40_p0 = scmp.ge.s32.totalorder %s38_s9, 2  ;;  %p54_p1 = scmp.ne.s32.totalorder %s1999_s26, %s1995_s25 }
   0xe   : > { %p55_p2 = scmp.eq.s32.totalorder %s2011_s29, 0  ;;  %p60_p3 = scmp.ne.s32.totalorder %s1995_s25, %s1991_s24 }
   0xf   : > { %s2855_s9 = smov (%p40_p0, %s38_s9), 0  ;;  %p61_p5 = scmp.eq.s32.totalorder %s1638_s30, 0 }
  0x10   : > { %2834 = sst [smem:[#allocation14_spill]] %s2855_s9  ;;  %p2160_p4 = por %p55_p2, %p54_p1 }
  0x11   : > { %s42_s12 = ssub.s32 %s2007_s28, %s2855_s9  ;;  %p228_p6 = scmp.eq.s32.totalorder %s1638_s30, 1 }
  0x12   : > { %p45_p7 = scmp.eq.s32.totalorder %s42_s12, 0  ;;  %p2166_p8 = por %p61_p5, %p60_p3 }
  0x13   : > { %p2170_p9 = por %p228_p6, %p54_p1  ;;  %p234_p10 = scmp.eq.s32.totalorder %s1639_s8, 1 }
  0x14   : > { %s2175_s15 = scalar_select %p45_p7, %s1999_s26, %s47_s10  }
  0x15   : > { %p2177_p11 = por %p234_p10, %p60_p3  ;;  %p1641_p12 = scmp.ge.s32.totalorder %s2011_s29, 2 }
  0x16   : > { %2838 = sst [smem:[#allocation15_spill]] %s2175_s15  ;;  %p1680_p13 = scmp.lt.s32.totalorder %s2011_s29, 2 }
  0x17   : > { %s2839_s16 = scalar_select %p2177_p11, 1, 0 }
  0x18   : > { %s2184_s17 = sand.u32 1, %s1999_s26   ;;  %s1659_s19 = sshll.u32 %s2007_s28, 5 }
  0x19   : > { %2840 = sst [smem:[#allocation16_spill]] %s2839_s16  ;;  %s1642_s18 = sshll.u32 %s2184_s17, 4 }
  0x1a   : > { %s2841_s0 = sld [smem:[#allocation17_spill]]  ;;  %s270_s23 = scalar_lea.vmem [#allocation3], %s1642_s18 }
  0x1b   : > { %s279_s30 = sshll.u32 %s270_s23, 4  ;;  %p2193_p0 = pnand %p1680_p13, %p2160_p4  ;;  %s280_s30 = int_to_ptr.vmem [resolvable:$true] %s279_s30 }
  0x1c   : > { %s267_s12 = scalar_lea.sflag [#allocation4], %s2184_s17  ;;  %s2013_s9 = smov 256  }
  0x1d   : > { %s2014_s28 = smov 128   ;;  %s2015_s15 = smov 8  }
  0x1e   : > { %p1648_p1 = scmp.ge.s32.totalorder %s2011_s29, 1  ;;  %p322_p2 = scmp.lt.s32.totalorder %s2011_s29, 3 }
  0x1f   : > { %s1552_s11 = scalar_lea.hbm %s2816_s1, %s1659_s19  ;;  %s293_s23 = scalar_lea.vmem [#allocation6], %s1642_s18 }
  0x20   : > { %s276_s22 = scalar_lea.hbm %s2841_s0, %s1659_s19  ;;  %p323_p3 = pnand %p1648_p1, %p322_p2 }
  0x21   : > { %s277_s8 = sshll.u32 %s276_s22, 4  ;;  %s1553_s22 = scalar_lea.hbm %s1552_s11, 8  ;;  %s278_s8 = int_to_ptr.hbm [resolvable:$true] %s277_s8 }
  0x22   : > { %1672 = dma.hbm_to_vmem [thread:$0]  (!%p2193_p0), %s278_s8, 256, %s280_s30, %s267_s12, %s2013_s9, %s2014_s28, %s2015_s15  }
  0x23   : > { %s303_s0 = sshll.u32 %s293_s23, 4  ;;  %s301_s26 = sshll.u32 %s1553_s22, 4  ;;  %s304_s0 = int_to_ptr.vmem [resolvable:$true] %s303_s0  ;;  %s302_s26 = int_to_ptr.hbm [resolvable:$true] %s301_s26 }
  0x24   : > { %s290_s16 = scalar_lea.sflag [#allocation7], %s2184_s17  ;;  %326 = sbr.rel (%p323_p3) target bundleno = 3011 (0xbc3), region = 48 }
  0x25   : > { %1675 = dma.hbm_to_vmem [thread:$0]  (!%p2193_p0), %s302_s26, 256, %s304_s0, %s290_s16, %s2013_s9, %s2014_s28, %s2015_s15  }
  0x26   : > { %s2209_s30 = sand.u32 (!%p323_p3), 1, %s1995_s25  }
  0x27   : > { %s1649_s8 = sshll.u32 (!%p323_p3), %s2209_s30, 4  ;;  %s329_s12 = scalar_lea.sflag (!%p323_p3), [#allocation4], %s2209_s30 }
  0x28   : > { %s2215_s19 = scalar_lea.vmem (!%p323_p3), [#allocation3], %s1649_s8 }
  0x29   : > { %1978 = dma.done.wait (%p2166_p8), %s329_s12, 256  }
  0x2a   : > { %1980 = vsyncadd (%p2166_p8), %s329_s12, 4294967040  ;;  %s339_s0 = scalar_lea.sflag [#allocation7], %s2209_s30 }
  0x2b   : > { %1982 = dma.done.wait (%p2166_p8), %s339_s0, 256  }
  0x2c   : > { %1984 = vsyncadd (%p2166_p8), %s339_s0, 4294967040  ;;  %v2016_v0 = vmov 0   ;;  %v2232_v1 = vld [vmem:[%s2820_s5] sm:$0xff]  ;;  %v2244_v4 = vld [vmem:[%s2820_s5 + $0x8] sm:$0xff]  ;;  %v2017_v7 = vmov 2   ;;  %v2018_v8 = vmov 1   ;;  %v460_v49 = vlaneseq }
  0x2d   : > { %1798 = vset.pattern.permute.xlu2 %v2016_v0  ;;  %1797 = vset.pattern.permute.xlu1 %v2016_v0  ;;  %v399_v2 = vld [vmem:[%s2819_s4] sm:$0xff]  ;;  %v400_v5 = vld [vmem:[%s2819_s4 + $0x8] sm:$0xff]  ;;  %v2019_v9 = vmov 3   ;;  %v2020_v16 = vmov 4   ;;  %v2021_v21 = vmov 5   ;;  %v2022_v26 = vmov 6  }
  0x2e   : > { %1796 = vset.pattern.permute.xlu0 %v2016_v0  ;;  %v397_v3 = vld [vmem:[%s2818_s3] sm:$0xff]  ;;  %526 = vperm.xlu2 %1798, %v2232_v1   ;;  %v398_v6 = vld [vmem:[%s2818_s3 + $0x8] sm:$0xff]  ;;  %v2023_v30 = vmov 7   ;;  %v2024_v33 = vmov 8   ;;  %v461_v51 = vand.u32 127, %v460_v49  ;;  %s2025_s22 = smov 127  }
  0x2f   : > { %450 = vperm.xlu1 %1797, %v399_v2   ;;  %438 = vperm.xlu0 %1796, %v397_v3   ;;  %v401_v10 = vld [vmem:[%s2215_s19] sm:$0xff]  ;;  %v402_v11 = vld [vmem:[%s2215_s19 + $0x8] sm:$0xff]  ;;  %s2026_s23 = smov 126   ;;  %s2027_s12 = smov 125   ;;  %vm566_vm6 = vcmask 1039360   ;;  %vm597_vm7 = vcmask 1031168  }
  0x30   : > { %v403_v12 = vadd.f32 %v402_v11, %v401_v10  ;;  %vm464_vm3 = vcmp.ge.s32.totalorder %v461_v51, 15  ;;  %vm465_vm4 = vcmp.lt.s32.totalorder %v461_v51, 31  ;;  %s2028_s19 = smov 124   ;;  %s2029_s0 = smov 123   ;;  %vm628_vm8 = vcmask 1022976  }
  0x31   : > { %vm466_vm5 = vmand %vm464_vm3, %vm465_vm4  ;;  %s2031_s26 = smov 122   ;;  %s2032_s28 = smov 121   ;;  %vm659_vm9 = vcmask 1014784   ;;  %vm690_vm10 = vcmask 1006592   ;;  %vm721_vm11 = vcmask 998400   ;;  %vm752_vm12 = vcmask 990208  }
  0x32   : > { %v404_v13 = vrot.slane %v403_v12, 4  ;;  %s2033_s9 = smov 120   ;;  %s2035_s15 = smov 119   ;;  %vm783_vm13 = vcmask 982016   ;;  %vm814_vm14 = vcmask 973824   ;;  %vm845_vm15 = vcmask 965632  }
  0x33   : > { %s2037_s16 = smov 118   ;;  %s2039_s17 = smov 117   ;;  %vm969_vm3 = vcmask 932864   ;;  %vm1000_vm4 = vcmask 924672  }
  0x34   : > { %v405_v14 = vadd.f32 %v404_v13, %v403_v12  ;;  %s2041_s13 = smov 116   ;;  %s2043_s18 = smov 115  }
  0x35   : > { %s2045_s10 = smov 114   ;;  %s2047_s20 = smov 113  }
  0x36   : > { %531 = vperm.xlu2 %1798, %v2244_v4   ;;  %v406_v15 = vrot.slane %v405_v14, 2  ;;  %s2049_s21 = smov 112   ;;  %s2051_s11 = smov 111  }
  0x37   : > { %455 = vperm.xlu1 %1797, %v400_v5   ;;  %443 = vperm.xlu0 %1796, %v398_v6   ;;  %p388_p4 = scmp.lt.s32.totalorder %s2003_s27, 1 }
  0x38   : > { %v407_v17 = vadd.f32 %v406_v15, %v405_v14 }
  0x3a   : > { %v408_v18 = vrot.slane %v407_v17, 1 }
  0x3c   : > { %v409_v19 = vadd.f32 %v408_v18, %v407_v17 }
  0x3e   : > { %1802 = vset.pattern.permute.xlu2 %v2017_v7  ;;  %v410_v20 = vmul.f32 0.0625, %v409_v19 }
  0x3f   : > { %1800 = vset.pattern.permute.xlu1 %v2018_v8  ;;  %1799 = vset.pattern.permute.xlu0 %v2018_v8 }
  0x40   : > { %578 = vperm.xlu2 %1802, %v2244_v4   ;;  %547 = vperm.xlu1 %1800, %v2244_v4   ;;  %v411_v22 = vsub.f32 %v401_v10, %v410_v20  ;;  %v412_v23 = vsub.f32 %v402_v11, %v410_v20 }
  0x41   : > { %543 = vperm.xlu0 %1799, %v2232_v1  }
  0x42   : > { %v413_v24 = vmul.f32 %v411_v22, %v411_v22  ;;  %v414_v25 = vmul.f32 %v412_v23, %v412_v23 }
  0x44   : > { %v415_v27 = vadd.f32 %v414_v25, %v413_v24  ;;  %v2030_v25 = vmov 9  }
  0x46   : > { %v416_v28 = vrot.slane %v415_v27, 4 }
  0x48   : > { %1804 = vset.pattern.permute.xlu2 %v2019_v9  ;;  %1801 = vset.pattern.permute.xlu1 %v2017_v7  ;;  %v417_v29 = vadd.f32 %v416_v28, %v415_v27 }
  0x49   : > { %609 = vperm.xlu2 %1804, %v2244_v4   ;;  %574 = vperm.xlu1 %1801, %v2232_v1  }
  0x4a   : > { %v418_v31 = vrot.slane %v417_v29, 2 }
  0x4c   : > { %v419_v32 = vadd.f32 %v418_v31, %v417_v29 }
  0x4e   : > { %v420_v34 = vrot.slane %v419_v32, 1 }
  0x50   : > { %v421_v35 = vadd.f32 %v420_v34, %v419_v32 }
  0x51   : > { %1806 = vset.pattern.permute.xlu2 %v2020_v16  ;;  %1803 = vset.pattern.permute.xlu1 %v2019_v9 }
  0x52   : > { %640 = vperm.xlu2 %1806, %v2244_v4   ;;  %605 = vperm.xlu1 %1803, %v2232_v1   ;;  %v422_v36 = vmul.f32 0.0625, %v421_v35 }
  0x54   : > { %v423_v37 = vadd.f32 1e-05, %v422_v36 }
  0x56   : > { %1861 = vrsqrt.f32 %v423_v37  ;;  %vm430_vm0 = vweird.f32 %v423_v37 }
  0x5a   : > { %1808 = vset.pattern.permute.xlu2 %v2021_v21  ;;  %1805 = vset.pattern.permute.xlu1 %v2020_v16 }
  0x5b   : > { %671 = vperm.xlu2 %1808, %v2244_v4   ;;  %636 = vperm.xlu1 %1805, %v2232_v1  }
  0x5c   : > { %v1862_v38 = vpop.eup %1861 }
  0x5d   : > { %v425_v39 = vmul.f32 %v1862_v38, %v423_v37  ;;  %vm431_vm1 = vweird.f32 %v1862_v38 }
  0x5e   : > { %vm432_vm2 = vmor %vm430_vm0, %vm431_vm1  ;;  %vm876_vm0 = vcmask 957440   ;;  %vm907_vm1 = vcmask 949248  }
  0x5f   : > { %v426_v40 = vmul.f32 %v1862_v38, %v425_v39 }
  0x61   : > { %v427_v41 = vmul.f32 0.5, %v426_v40 }
  0x63   : > { %1810 = vset.pattern.permute.xlu2 %v2022_v26  ;;  %1807 = vset.pattern.permute.xlu1 %v2021_v21  ;;  %v428_v43 = vsub.f32 1.5, %v427_v41 }
  0x64   : > { %702 = vperm.xlu2 %1810, %v2244_v4   ;;  %667 = vperm.xlu1 %1807, %v2232_v1  }
  0x65   : > { %v429_v44 = vmul.f32 %v1862_v38, %v428_v43 }
  0x67   : > { %v433_v47 = vsel %vm432_vm2, %v1862_v38, %v429_v44  ;;  %vm938_vm2 = vcmask 941056  }
  0x68   : > { %v434_v50 = vmul.f32 %v433_v47, %v411_v22  ;;  %v435_v57 = vmul.f32 %v433_v47, %v412_v23 }
  0x6c   : > { %1812 = vset.pattern.permute.xlu2 %v2023_v30  ;;  %1809 = vset.pattern.permute.xlu1 %v2022_v26 }
  0x6d   : > { %733 = vperm.xlu2 %1812, %v2244_v4   ;;  %698 = vperm.xlu1 %1809, %v2232_v1  }
  0x75   : > { %1814 = vset.pattern.permute.xlu2 %v2024_v33  ;;  %1811 = vset.pattern.permute.xlu1 %v2023_v30 }
  0x76   : > { %764 = vperm.xlu2 %1814, %v2244_v4   ;;  %729 = vperm.xlu1 %1811, %v2232_v1  }
  0x7e   : > { %1813 = vset.pattern.permute.xlu1 %v2024_v33  ;;  %1816 = vset.pattern.permute.xlu2 %v2030_v25 }
  0x88   : > { %v2270_v42 = vpop.permute.xlu2 %526 }
  0x90   : > { %v2272_v48 = vpop.permute.xlu2 %531 }
  0x9a   : > { %v579_v55 = vpop.permute.xlu2 %578 }
  0x9b   : > { %v584_v6 = vmul.f32 0.0, %v579_v55 }
  0xa1   : > { %v451_v45 = vpop.permute.xlu1 %450  ;;  %v439_v46 = vpop.permute.xlu0 %438 }
  0xa2   : > { %v446_v54 = vmul.f32 %v439_v46, %v434_v50 }
  0xa3   : > { %v610_v5 = vpop.permute.xlu2 %609 }
  0xa4   : > { %v458_v56 = vadd.f32 %v451_v45, %v446_v54  ;;  %v615_v11 = vmul.f32 0.0, %v610_v5 }
  0xa6   : > { %v2274_v58 = vsel %vm466_vm5, %v458_v56, 0.0 }
  0xa9   : > { %v456_v52 = vpop.permute.xlu1 %455  ;;  %v444_v53 = vpop.permute.xlu0 %443 }
  0xaa   : > { %v447_v59 = vmul.f32 %v444_v53, %v435_v57 }
  0xac   : > { %v459_v3 = vadd.f32 %v456_v52, %v447_v59  ;;  %v641_v12 = vpop.permute.xlu2 %640 }
  0xad   : > { %v646_v16 = vmul.f32 0.0, %v641_v12 }
  0xae   : > { %v2277_v7 = vsel %vm466_vm5, %v459_v3, 0.0  ;;  %vm1031_vm5 = vcmask 916480  }
  0xaf   : > { %v583_v13 = vmul.f32 %v579_v55, %v2277_v7  ;;  %v614_v17 = vmul.f32 %v610_v5, %v2277_v7  ;;  %v645_v22 = vmul.f32 %v641_v12, %v2277_v7  ;;  %v535_v3 = vmul.f32 %v2272_v48, %v2277_v7 }
  0xb2   : > { %v548_v60 = vpop.permute.xlu1 %547 }
  0xb3   : > { %v544_v61 = vpop.permute.xlu0 %543  ;;  %v553_v62 = vmul.f32 0.0, %v548_v60  ;;  %v552_v8 = vmul.f32 %v548_v60, %v2277_v7 }
  0xb4   : > { %v550_v63 = vmul.f32 %v544_v61, %v2274_v58  ;;  %v551_v2 = vmul.f32 0.0, %v544_v61 }
  0xb5   : > { %564 = vrot.lane.b32.xlu0 %v553_v62, %s2025_s22  ;;  %v672_v18 = vpop.permute.xlu2 %671 }
  0xb6   : > { %558 = vrot.lane.b32.xlu2 %v550_v63, %s2025_s22  ;;  %560 = vrot.lane.b32.xlu1 %v551_v2, %s2025_s22  ;;  %v677_v21 = vmul.f32 0.0, %v672_v18  ;;  %v676_v28 = vmul.f32 %v672_v18, %v2277_v7  ;;  %v2034_v63 = vmov 10  }
  0xbb   : > { %v575_v9 = vpop.permute.xlu1 %574 }
  0xbc   : > { %v582_v10 = vmul.f32 0.0, %v575_v9  ;;  %v581_v36 = vmul.f32 %v575_v9, %v2274_v58 }
  0xbd   : > { %595 = vrot.lane.b32.xlu0 %v584_v6, %s2026_s23 }
  0xbe   : > { %562 = vrot.lane.b32.xlu2 %v552_v8, %s2025_s22  ;;  %591 = vrot.lane.b32.xlu1 %v582_v10, %s2026_s23  ;;  %v703_v23 = vpop.permute.xlu2 %702  ;;  %s2053_s22 = smov 110  }
  0xbf   : > { %v708_v27 = vmul.f32 0.0, %v703_v23  ;;  %v707_v33 = vmul.f32 %v703_v23, %v2277_v7 }
  0xc4   : > { %v606_v14 = vpop.permute.xlu1 %605 }
  0xc5   : > { %v613_v15 = vmul.f32 0.0, %v606_v14  ;;  %626 = vrot.lane.b32.xlu0 %v615_v11, %s2027_s12  ;;  %v612_v39 = vmul.f32 %v606_v14, %v2274_v58 }
  0xc6   : > { %593 = vrot.lane.b32.xlu2 %v583_v13, %s2026_s23 }
  0xc7   : > { %622 = vrot.lane.b32.xlu1 %v613_v15, %s2027_s12  ;;  %v734_v30 = vpop.permute.xlu2 %733 }
  0xc8   : > { %v739_v32 = vmul.f32 0.0, %v734_v30  ;;  %v738_v37 = vmul.f32 %v734_v30, %v2277_v7 }
  0xcd   : > { %v637_v19 = vpop.permute.xlu1 %636  ;;  %657 = vrot.lane.b32.xlu0 %v646_v16, %s2028_s19 }
  0xce   : > { %624 = vrot.lane.b32.xlu2 %v614_v17, %s2027_s12  ;;  %v644_v20 = vmul.f32 0.0, %v637_v19  ;;  %v643_v41 = vmul.f32 %v637_v19, %v2274_v58 }
  0xd0   : > { %653 = vrot.lane.b32.xlu1 %v644_v20, %s2028_s19  ;;  %v2303_v38 = vpop.permute.xlu2 %764 }
  0xd1   : > { %v769_v40 = vmul.f32 %v2303_v38, %v2277_v7 }
  0xd5   : > { %688 = vrot.lane.b32.xlu0 %v677_v21, %s2029_s0 }
  0xd6   : > { %655 = vrot.lane.b32.xlu2 %v645_v22, %s2028_s19  ;;  %v668_v24 = vpop.permute.xlu1 %667 }
  0xd7   : > { %v675_v26 = vmul.f32 0.0, %v668_v24  ;;  %v674_v43 = vmul.f32 %v668_v24, %v2274_v58 }
  0xd9   : > { %684 = vrot.lane.b32.xlu1 %v675_v26, %s2029_s0 }
  0xdd   : > { %719 = vrot.lane.b32.xlu0 %v708_v27, %s2031_s26 }
  0xde   : > { %686 = vrot.lane.b32.xlu2 %v676_v28, %s2029_s0 }
  0xdf   : > { %v699_v29 = vpop.permute.xlu1 %698 }
  0xe0   : > { %v706_v31 = vmul.f32 0.0, %v699_v29  ;;  %v705_v44 = vmul.f32 %v699_v29, %v2274_v58 }
  0xe2   : > { %715 = vrot.lane.b32.xlu1 %v706_v31, %s2031_s26 }
  0xe5   : > { %750 = vrot.lane.b32.xlu0 %v739_v32, %s2032_s28 }
  0xe6   : > { %717 = vrot.lane.b32.xlu2 %v707_v33, %s2031_s26  ;;  %v770_v33 = vmul.f32 0.0, %v2303_v38 }
  0xe8   : > { %v730_v34 = vpop.permute.xlu1 %729 }
  0xe9   : > { %v737_v35 = vmul.f32 0.0, %v730_v34  ;;  %v736_v46 = vmul.f32 %v730_v34, %v2274_v58 }
  0xeb   : > { %746 = vrot.lane.b32.xlu1 %v737_v35, %s2032_s28 }
  0xed   : > { %589 = vrot.lane.b32.xlu0 %v581_v36, %s2026_s23  ;;  %v534_v36 = vmul.f32 %v2270_v42, %v2274_v58  ;;  %s2055_s23 = smov 109  }
  0xee   : > { %748 = vrot.lane.b32.xlu2 %v738_v37, %s2032_s28 }
  0xf3   : > { %760 = vperm.xlu1 %1813, %v2232_v1  }
  0xf5   : > { %620 = vrot.lane.b32.xlu0 %v612_v39, %s2027_s12  ;;  %s2057_s12 = smov 108  }
  0xf6   : > { %779 = vrot.lane.b32.xlu2 %v769_v40, %s2033_s9 }
  0xfb   : > { %1815 = vset.pattern.permute.xlu1 %v2030_v25 }
  0xfd   : > { %651 = vrot.lane.b32.xlu0 %v643_v41, %s2028_s19  ;;  %s2059_s19 = smov 107  }
  0xfe   : > { %795 = vperm.xlu2 %1816, %v2244_v4  }
 0x105   : > { %682 = vrot.lane.b32.xlu0 %v674_v43, %s2029_s0  ;;  %s389_s0 = scalar_select %p388_p4, %s2003_s27, 1 }
 0x106   : > { %1818 = vset.pattern.permute.xlu2 %v2034_v63 }
 0x10d   : > { %713 = vrot.lane.b32.xlu0 %v705_v44, %s2031_s26  ;;  %s1661_s26 = sshll.u32 %s389_s0, 4 }
 0x110   : > { %v2318_v45 = vpop.permute.xlu2 %558 }
 0x115   : > { %744 = vrot.lane.b32.xlu0 %v736_v46, %s2032_s28  ;;  %s2061_s28 = smov 106  }
 0x118   : > { %v563_v47 = vpop.permute.xlu2 %562 }
 0x120   : > { %v594_v49 = vpop.permute.xlu2 %593 }
 0x127   : > { %v565_v51 = vpop.permute.xlu0 %564 }
 0x128   : > { %v625_v50 = vpop.permute.xlu2 %624  ;;  %v561_v52 = vpop.permute.xlu1 %560  ;;  %v568_v2 = vsel %vm566_vm6, %v563_v47, %v565_v51 }
 0x129   : > { %v572_v6 = vadd.f32 %v568_v2, %v535_v3  ;;  %v567_v35 = vsel %vm566_vm6, %v2318_v45, %v561_v52  ;;  %vm1062_vm6 = vcmask 908288  }
 0x12a   : > { %v571_v39 = vadd.f32 %v567_v35, %v534_v36 }
 0x12f   : > { %v596_v54 = vpop.permute.xlu0 %595 }
 0x130   : > { %v656_v53 = vpop.permute.xlu2 %655  ;;  %v592_v55 = vpop.permute.xlu1 %591  ;;  %v599_v5 = vsel %vm597_vm7, %v594_v49, %v596_v54  ;;  %v2036_v54 = vmov 11  }
 0x131   : > { %v603_v11 = vadd.f32 %v599_v5, %v572_v6  ;;  %v2038_v6 = vmov 12  }
 0x137   : > { %v627_v57 = vpop.permute.xlu0 %626 }
 0x138   : > { %v687_v56 = vpop.permute.xlu2 %686  ;;  %v630_v10 = vsel %vm628_vm8, %v625_v50, %v627_v57 }
 0x139   : > { %v623_v59 = vpop.permute.xlu1 %622  ;;  %v634_v13 = vadd.f32 %v630_v10, %v603_v11 }
 0x13f   : > { %v658_v61 = vpop.permute.xlu0 %657 }
 0x140   : > { %v718_v60 = vpop.permute.xlu2 %717  ;;  %v661_v12 = vsel %vm659_vm9, %v656_v53, %v658_v61 }
 0x141   : > { %v665_v16 = vadd.f32 %v661_v12, %v634_v13 }
 0x142   : > { %v654_v62 = vpop.permute.xlu1 %653 }
 0x147   : > { %v689_v9 = vpop.permute.xlu0 %688 }
 0x148   : > { %v749_v8 = vpop.permute.xlu2 %748  ;;  %v692_v15 = vsel %vm690_vm10, %v687_v56, %v689_v9 }
 0x149   : > { %v696_v48 = vadd.f32 %v692_v15, %v665_v16 }
 0x14b   : > { %v685_v14 = vpop.permute.xlu1 %684 }
 0x14f   : > { %v720_v18 = vpop.permute.xlu0 %719 }
 0x150   : > { %v2328_v17 = vpop.permute.xlu2 %779  ;;  %v723_v19 = vsel %vm721_vm11, %v718_v60, %v720_v18 }
 0x151   : > { %v727_v20 = vadd.f32 %v723_v19, %v696_v48 }
 0x154   : > { %v716_v21 = vpop.permute.xlu1 %715 }
 0x157   : > { %v751_v23 = vpop.permute.xlu0 %750 }
 0x158   : > { %v796_v22 = vpop.permute.xlu2 %795  ;;  %v754_v25 = vsel %vm752_vm12, %v749_v8, %v751_v23 }
 0x159   : > { %v800_v24 = vmul.f32 %v796_v22, %v2277_v7  ;;  %v2333_v26 = vadd.f32 %v754_v25, %v727_v20  ;;  %v801_v5 = vmul.f32 0.0, %v796_v22  ;;  %v2040_v20 = vmov 13  }
 0x15a   : > { %v2042_v25 = vmov 14  }
 0x15b   : > { %810 = vrot.lane.b32.xlu2 %v800_v24, %s2035_s15 }
 0x15d   : > { %v747_v27 = vpop.permute.xlu1 %746 }
 0x15f   : > { %v590_v28 = vpop.permute.xlu0 %589 }
 0x160   : > { %v598_v37 = vsel %vm597_vm7, %v590_v28, %v592_v55  ;;  %vm1093_vm7 = vcmask 900096  }
 0x161   : > { %v602_v43 = vadd.f32 %v598_v37, %v571_v39  ;;  %v2044_v39 = vmov 15  }
 0x163   : > { %826 = vperm.xlu2 %1818, %v2244_v4  }
 0x165   : > { %v761_v29 = vpop.permute.xlu1 %760 }
 0x166   : > { %v767_v30 = vmul.f32 %v761_v29, %v2274_v58  ;;  %v768_v31 = vmul.f32 0.0, %v761_v29 }
 0x167   : > { %v621_v32 = vpop.permute.xlu0 %620 }
 0x168   : > { %775 = vrot.lane.b32.xlu0 %v767_v30, %s2033_s9  ;;  %777 = vrot.lane.b32.xlu1 %v768_v31, %s2033_s9  ;;  %v629_v41 = vsel %vm628_vm8, %v621_v32, %v623_v59  ;;  %vm1124_vm8 = vcmask 891904  }
 0x169   : > { %v633_v44 = vadd.f32 %v629_v41, %v602_v43 }
 0x16b   : > { %1820 = vset.pattern.permute.xlu2 %v2036_v54 }
 0x16f   : > { %v652_v34 = vpop.permute.xlu0 %651 }
 0x170   : > { %781 = vrot.lane.b32.xlu0 %v770_v33, %s2033_s9  ;;  %791 = vperm.xlu1 %1815, %v2232_v1   ;;  %v660_v38 = vsel %vm659_vm9, %v652_v34, %v654_v62  ;;  %vm1155_vm9 = vcmask 883712  }
 0x171   : > { %v664_v47 = vadd.f32 %v660_v38, %v633_v44 }
 0x177   : > { %v683_v40 = vpop.permute.xlu0 %682 }
 0x178   : > { %1817 = vset.pattern.permute.xlu1 %v2034_v63  ;;  %v691_v46 = vsel %vm690_vm10, %v683_v40, %v685_v14  ;;  %vm1186_vm10 = vcmask 875520  }
 0x179   : > { %v695_v49 = vadd.f32 %v691_v46, %v664_v47 }
 0x17f   : > { %v714_v50 = vpop.permute.xlu0 %713 }
 0x180   : > { %v722_v45 = vsel %vm721_vm11, %v714_v50, %v716_v21  ;;  %vm1217_vm11 = vcmask 867328  }
 0x181   : > { %v726_v51 = vadd.f32 %v722_v45, %v695_v49 }
 0x187   : > { %v745_v42 = vpop.permute.xlu0 %744 }
 0x188   : > { %v753_v52 = vsel %vm752_vm12, %v745_v42, %v747_v27  ;;  %vm2827_vm12 = vcmask 859136  }
 0x189   : > { %v757_v53 = vadd.f32 %v753_v52, %v726_v51  ;;  %v2046_v52 = vmov 16  }
 0x1b5   : > { %v2353_v55 = vpop.permute.xlu2 %810 }
 0x1bd   : > { %v827_v56 = vpop.permute.xlu2 %826 }
 0x1be   : > { %v831_v57 = vmul.f32 %v827_v56, %v2277_v7  ;;  %v832_v19 = vmul.f32 0.0, %v827_v56 }
 0x1c0   : > { %841 = vrot.lane.b32.xlu2 %v831_v57, %s2037_s16 }
 0x1c8   : > { %857 = vperm.xlu2 %1820, %v2244_v4  }
 0x1d0   : > { %1822 = vset.pattern.permute.xlu2 %v2038_v6 }
 0x1da   : > { %v778_v59 = vpop.permute.xlu1 %777  ;;  %v776_v60 = vpop.permute.xlu0 %775 }
 0x1db   : > { %v784_v61 = vsel %vm783_vm13, %v776_v60, %v778_v59 }
 0x1dc   : > { %v788_v62 = vadd.f32 %v784_v61, %v757_v53 }
 0x1e2   : > { %v792_v63 = vpop.permute.xlu1 %791  ;;  %v2369_v11 = vpop.permute.xlu0 %781 }
 0x1e3   : > { %v798_v2 = vmul.f32 %v792_v63, %v2274_v58  ;;  %v799_v3 = vmul.f32 0.0, %v792_v63 }
 0x1e5   : > { %806 = vrot.lane.b32.xlu0 %v798_v2, %s2035_s15  ;;  %808 = vrot.lane.b32.xlu1 %v799_v3, %s2035_s15 }
 0x1ed   : > { %812 = vrot.lane.b32.xlu0 %v801_v5, %s2035_s15  ;;  %822 = vperm.xlu1 %1817, %v2232_v1   ;;  %s395_s15 = scalar_lea.vmem %s2817_s2, %s1661_s26 }
 0x1f5   : > { %1819 = vset.pattern.permute.xlu1 %v2036_v54 }
 0x21a   : > { %v2364_v8 = vpop.permute.xlu2 %841 }
 0x222   : > { %v858_v9 = vpop.permute.xlu2 %857 }
 0x223   : > { %v862_v10 = vmul.f32 %v858_v9, %v2277_v7  ;;  %v863_v34 = vmul.f32 0.0, %v858_v9 }
 0x225   : > { %872 = vrot.lane.b32.xlu2 %v862_v10, %s2039_s17 }
 0x22d   : > { %888 = vperm.xlu2 %1822, %v2244_v4  }
 0x235   : > { %1824 = vset.pattern.permute.xlu2 %v2040_v20 }
 0x257   : > { %v809_v12 = vpop.permute.xlu1 %808  ;;  %v807_v13 = vpop.permute.xlu0 %806 }
 0x258   : > { %v815_v14 = vsel %vm814_vm14, %v807_v13, %v809_v12 }
 0x259   : > { %v819_v15 = vadd.f32 %v815_v14, %v788_v62 }
 0x25f   : > { %v823_v16 = vpop.permute.xlu1 %822  ;;  %v2382_v24 = vpop.permute.xlu0 %812 }
 0x260   : > { %v829_v48 = vmul.f32 %v823_v16, %v2274_v58  ;;  %v830_v18 = vmul.f32 0.0, %v823_v16 }
 0x262   : > { %837 = vrot.lane.b32.xlu0 %v829_v48, %s2037_s16  ;;  %839 = vrot.lane.b32.xlu1 %v830_v18, %s2037_s16 }
 0x26a   : > { %843 = vrot.lane.b32.xlu0 %v832_v19, %s2037_s16  ;;  %853 = vperm.xlu1 %1819, %v2232_v1   ;;  %s2063_s16 = smov 105  }
 0x272   : > { %1821 = vset.pattern.permute.xlu1 %v2038_v6  ;;  %v2048_v6 = vmov 17  }
 0x27f   : > { %v2377_v21 = vpop.permute.xlu2 %872 }
 0x287   : > { %v889_v22 = vpop.permute.xlu2 %888 }
 0x288   : > { %v893_v23 = vmul.f32 %v889_v22, %v2277_v7  ;;  %v894_v42 = vmul.f32 0.0, %v889_v22 }
 0x28a   : > { %903 = vrot.lane.b32.xlu2 %v893_v23, %s2041_s13  ;;  %v2050_v23 = vmov 18  }
 0x292   : > { %919 = vperm.xlu2 %1824, %v2244_v4  }
 0x29a   : > { %1826 = vset.pattern.permute.xlu2 %v2042_v25 }
 0x2d4   : > { %v840_v27 = vpop.permute.xlu1 %839  ;;  %v838_v28 = vpop.permute.xlu0 %837 }
 0x2d5   : > { %v846_v29 = vsel %vm845_vm15, %v838_v28, %v840_v27 }
 0x2d6   : > { %v850_v30 = vadd.f32 %v846_v29, %v819_v15 }
 0x2dc   : > { %v854_v31 = vpop.permute.xlu1 %853  ;;  %v2397_v41 = vpop.permute.xlu0 %843 }
 0x2dd   : > { %v860_v32 = vmul.f32 %v854_v31, %v2274_v58  ;;  %v861_v33 = vmul.f32 0.0, %v854_v31 }
 0x2df   : > { %868 = vrot.lane.b32.xlu0 %v860_v32, %s2039_s17  ;;  %870 = vrot.lane.b32.xlu1 %v861_v33, %s2039_s17  ;;  %v2052_v32 = vmov 19  }
 0x2e4   : > { %v2388_v35 = vpop.permute.xlu2 %903 }
 0x2e7   : > { %874 = vrot.lane.b32.xlu0 %v863_v34, %s2039_s17  ;;  %884 = vperm.xlu1 %1821, %v2232_v1   ;;  %s2065_s17 = smov 104  }
 0x2ec   : > { %v920_v36 = vpop.permute.xlu2 %919 }
 0x2ed   : > { %v924_v37 = vmul.f32 %v920_v36, %v2277_v7  ;;  %v925_v5 = vmul.f32 0.0, %v920_v36 }
 0x2ef   : > { %934 = vrot.lane.b32.xlu2 %v924_v37, %s2043_s18  ;;  %1823 = vset.pattern.permute.xlu1 %v2040_v20 }
 0x2f7   : > { %950 = vperm.xlu2 %1826, %v2244_v4  }
 0x2ff   : > { %1828 = vset.pattern.permute.xlu2 %v2044_v39 }
 0x349   : > { %v2395_v40 = vpop.permute.xlu2 %934 }
 0x351   : > { %v951_v43 = vpop.permute.xlu2 %950  ;;  %v871_v44 = vpop.permute.xlu1 %870 }
 0x352   : > { %v955_v38 = vmul.f32 %v951_v43, %v2277_v7  ;;  %v869_v46 = vpop.permute.xlu0 %868  ;;  %v956_v22 = vmul.f32 0.0, %v951_v43 }
 0x353   : > { %v877_v47 = vsel %vm876_vm0, %v869_v46, %v871_v44 }
 0x354   : > { %v881_v49 = vadd.f32 %v877_v47, %v850_v30  ;;  %965 = vrot.lane.b32.xlu2 %v955_v38, %s2045_s10  ;;  %v2054_v47 = vmov 20  }
 0x359   : > { %v885_v50 = vpop.permute.xlu1 %884 }
 0x35a   : > { %v891_v45 = vmul.f32 %v885_v50, %v2274_v58  ;;  %v892_v51 = vmul.f32 0.0, %v885_v50  ;;  %v2416_v57 = vpop.permute.xlu0 %874 }
 0x35c   : > { %981 = vperm.xlu2 %1828, %v2244_v4   ;;  %899 = vrot.lane.b32.xlu0 %v891_v45, %s2041_s13 }
 0x35d   : > { %901 = vrot.lane.b32.xlu1 %v892_v51, %s2041_s13 }
 0x364   : > { %905 = vrot.lane.b32.xlu0 %v894_v42, %s2041_s13  ;;  %1830 = vset.pattern.permute.xlu2 %v2046_v52  ;;  %s2067_s13 = smov 103  }
 0x365   : > { %915 = vperm.xlu1 %1823, %v2232_v1  }
 0x36d   : > { %1825 = vset.pattern.permute.xlu1 %v2042_v25 }
 0x3ae   : > { %v2408_v53 = vpop.permute.xlu2 %965 }
 0x3b6   : > { %v2410_v54 = vpop.permute.xlu2 %981 }
 0x3b7   : > { %v986_v56 = vmul.f32 %v2410_v54, %v2277_v7  ;;  %v987_v43 = vmul.f32 0.0, %v2410_v54 }
 0x3b9   : > { %996 = vrot.lane.b32.xlu2 %v986_v56, %s2047_s20 }
 0x3c1   : > { %1012 = vperm.xlu2 %1830, %v2244_v4  }
 0x3c9   : > { %1832 = vset.pattern.permute.xlu2 %v2048_v6 }
 0x3ce   : > { %v900_v60 = vpop.permute.xlu0 %899 }
 0x3cf   : > { %v902_v59 = vpop.permute.xlu1 %901 }
 0x3d0   : > { %v908_v61 = vsel %vm907_vm1, %v900_v60, %v902_v59 }
 0x3d1   : > { %v912_v62 = vadd.f32 %v908_v61, %v881_v49 }
 0x3d6   : > { %v2432_v13 = vpop.permute.xlu0 %905 }
 0x3d7   : > { %v916_v63 = vpop.permute.xlu1 %915 }
 0x3d8   : > { %v922_v2 = vmul.f32 %v916_v63, %v2274_v58  ;;  %v923_v3 = vmul.f32 0.0, %v916_v63  ;;  %v2056_v63 = vmov 21  }
 0x3da   : > { %930 = vrot.lane.b32.xlu0 %v922_v2, %s2043_s18  ;;  %932 = vrot.lane.b32.xlu1 %v923_v3, %s2043_s18 }
 0x3e2   : > { %936 = vrot.lane.b32.xlu0 %v925_v5, %s2043_s18  ;;  %946 = vperm.xlu1 %1825, %v2232_v1   ;;  %s2070_s18 = smov 102  }
 0x3ea   : > { %1827 = vset.pattern.permute.xlu1 %v2044_v39 }
 0x413   : > { %v2424_v9 = vpop.permute.xlu2 %996 }
 0x41b   : > { %v2426_v10 = vpop.permute.xlu2 %1012 }
 0x41c   : > { %v1017_v12 = vmul.f32 %v2426_v10, %v2277_v7 }
 0x41e   : > { %1027 = vrot.lane.b32.xlu2 %v1017_v12, %s2049_s21 }
 0x426   : > { %1043 = vperm.xlu2 %1832, %v2244_v4  }
 0x42e   : > { %1834 = vset.pattern.permute.xlu2 %v2050_v23 }
 0x44c   : > { %v933_v14 = vpop.permute.xlu1 %932  ;;  %v931_v15 = vpop.permute.xlu0 %930 }
 0x44d   : > { %v939_v16 = vsel %vm938_vm2, %v931_v15, %v933_v14 }
 0x44e   : > { %v943_v48 = vadd.f32 %v939_v16, %v912_v62  ;;  %v1018_v62 = vmul.f32 0.0, %v2426_v10 }
 0x454   : > { %v947_v18 = vpop.permute.xlu1 %946  ;;  %v2448_v29 = vpop.permute.xlu0 %936 }
 0x455   : > { %v953_v19 = vmul.f32 %v947_v18, %v2274_v58  ;;  %v954_v20 = vmul.f32 0.0, %v947_v18 }
 0x457   : > { %961 = vrot.lane.b32.xlu0 %v953_v19, %s2045_s10  ;;  %963 = vrot.lane.b32.xlu1 %v954_v20, %s2045_s10  ;;  %v2058_v20 = vmov 22  }
 0x45f   : > { %967 = vrot.lane.b32.xlu0 %v956_v22, %s2045_s10  ;;  %977 = vperm.xlu1 %1827, %v2232_v1   ;;  %s2073_s10 = smov 100  }
 0x467   : > { %1829 = vset.pattern.permute.xlu1 %v2046_v52 }
 0x478   : > { %v2440_v25 = vpop.permute.xlu2 %1027 }
 0x480   : > { %v2442_v27 = vpop.permute.xlu2 %1043 }
 0x481   : > { %v1048_v28 = vmul.f32 %v2442_v27, %v2277_v7  ;;  %v1049_v19 = vmul.f32 0.0, %v2442_v27 }
 0x483   : > { %1058 = vrot.lane.b32.xlu2 %v1048_v28, %s2051_s11 }
 0x48b   : > { %1074 = vperm.xlu2 %1834, %v2244_v4  }
 0x493   : > { %1836 = vset.pattern.permute.xlu2 %v2052_v32 }
 0x4c9   : > { %v964_v30 = vpop.permute.xlu1 %963  ;;  %v962_v31 = vpop.permute.xlu0 %961 }
 0x4ca   : > { %v970_v33 = vsel %vm969_vm3, %v962_v31, %v964_v30 }
 0x4cb   : > { %v974_v34 = vadd.f32 %v970_v33, %v943_v48 }
 0x4d1   : > { %v978_v36 = vpop.permute.xlu1 %977  ;;  %v2467_v49 = vpop.permute.xlu0 %967 }
 0x4d2   : > { %v984_v37 = vmul.f32 %v978_v36, %v2274_v58  ;;  %v985_v39 = vmul.f32 0.0, %v978_v36 }
 0x4d4   : > { %992 = vrot.lane.b32.xlu0 %v984_v37, %s2047_s20  ;;  %994 = vrot.lane.b32.xlu1 %v985_v39, %s2047_s20  ;;  %v2060_v39 = vmov 23  }
 0x4dc   : > { %998 = vrot.lane.b32.xlu0 %v987_v43, %s2047_s20  ;;  %1008 = vperm.xlu1 %1829, %v2232_v1   ;;  %s2074_s20 = smov 101  }
 0x4dd   : > { %v2458_v38 = vpop.permute.xlu2 %1058 }
 0x4e4   : > { %1831 = vset.pattern.permute.xlu1 %v2048_v6 }
 0x4e5   : > { %v2460_v44 = vpop.permute.xlu2 %1074 }
 0x4e6   : > { %v1079_v46 = vmul.f32 %v2460_v44, %v2277_v7  ;;  %v1080_v37 = vmul.f32 0.0, %v2460_v44 }
 0x4e8   : > { %1089 = vrot.lane.b32.xlu2 %v1079_v46, %s2053_s22 }
 0x4f0   : > { %1105 = vperm.xlu2 %1836, %v2244_v4  }
 0x4f8   : > { %1838 = vset.pattern.permute.xlu2 %v2054_v47 }
 0x542   : > { %v2469_v50 = vpop.permute.xlu2 %1089 }
 0x546   : > { %v995_v45 = vpop.permute.xlu1 %994  ;;  %v993_v51 = vpop.permute.xlu0 %992 }
 0x547   : > { %v1001_v42 = vsel %vm1000_vm4, %v993_v51, %v995_v45  ;;  %v2538_v45 = vld [vmem:[%s2820_s5 + $0x8] sm:$0xff] }
 0x548   : > { %v1005_v52 = vadd.f32 %v1001_v42, %v974_v34 }
 0x54a   : > { %v2472_v54 = vpop.permute.xlu2 %1105 }
 0x54b   : > { %v1110_v56 = vmul.f32 %v2472_v54, %v2277_v7 }
 0x54d   : > { %1120 = vrot.lane.b32.xlu2 %v1110_v56, %s2055_s23 }
 0x54e   : > { %v1009_v59 = vpop.permute.xlu1 %1008  ;;  %v2493_v6 = vpop.permute.xlu0 %998 }
 0x54f   : > { %v1015_v60 = vmul.f32 %v1009_v59, %v2274_v58  ;;  %v1016_v61 = vmul.f32 0.0, %v1009_v59  ;;  %v2062_v59 = vmov 24  }
 0x551   : > { %1023 = vrot.lane.b32.xlu0 %v1015_v60, %s2049_s21  ;;  %1025 = vrot.lane.b32.xlu1 %v1016_v61, %s2049_s21 }
 0x555   : > { %1136 = vperm.xlu2 %1838, %v2244_v4  }
 0x559   : > { %1029 = vrot.lane.b32.xlu0 %v1018_v62, %s2049_s21  ;;  %1039 = vperm.xlu1 %1831, %v2232_v1   ;;  %s2075_s21 = smov 99  }
 0x55d   : > { %1840 = vset.pattern.permute.xlu2 %v2056_v63 }
 0x561   : > { %1833 = vset.pattern.permute.xlu1 %v2050_v23 }
 0x5a7   : > { %v2485_v2 = vpop.permute.xlu2 %1120 }
 0x5af   : > { %v2487_v3 = vpop.permute.xlu2 %1136 }
 0x5b0   : > { %v1141_v5 = vmul.f32 %v2487_v3, %v2277_v7 }
 0x5b2   : > { %1151 = vrot.lane.b32.xlu2 %v1141_v5, %s2057_s12  ;;  %v1111_v5 = vmul.f32 0.0, %v2472_v54 }
 0x5ba   : > { %1167 = vperm.xlu2 %1840, %v2244_v4  }
 0x5c2   : > { %1842 = vset.pattern.permute.xlu2 %v2058_v20 }
 0x5c3   : > { %v1026_v10 = vpop.permute.xlu1 %1025  ;;  %v1024_v12 = vpop.permute.xlu0 %1023 }
 0x5c4   : > { %v1032_v14 = vsel %vm1031_vm5, %v1024_v12, %v1026_v10 }
 0x5c5   : > { %v1036_v15 = vadd.f32 %v1032_v14, %v1005_v52 }
 0x5cb   : > { %v1040_v16 = vpop.permute.xlu1 %1039  ;;  %v2512_v27 = vpop.permute.xlu0 %1029 }
 0x5cc   : > { %v1046_v48 = vmul.f32 %v1040_v16, %v2274_v58  ;;  %v1047_v18 = vmul.f32 0.0, %v1040_v16 }
 0x5ce   : > { %1054 = vrot.lane.b32.xlu0 %v1046_v48, %s2051_s11  ;;  %1056 = vrot.lane.b32.xlu1 %v1047_v18, %s2051_s11 }
 0x5d6   : > { %1060 = vrot.lane.b32.xlu0 %v1049_v19, %s2051_s11  ;;  %1070 = vperm.xlu1 %1833, %v2232_v1   ;;  %s2076_s11 = smov 98  }
 0x5de   : > { %1835 = vset.pattern.permute.xlu1 %v2052_v32 }
 0x60c   : > { %v2504_v22 = vpop.permute.xlu2 %1151 }
 0x614   : > { %v2506_v23 = vpop.permute.xlu2 %1167 }
 0x615   : > { %v1172_v28 = vmul.f32 %v2506_v23, %v2277_v7 }
 0x617   : > { %1182 = vrot.lane.b32.xlu2 %v1172_v28, %s2059_s19 }
 0x61f   : > { %1198 = vperm.xlu2 %1842, %v2244_v4   ;;  %v2523_v4 = vld [vmem:[%s2820_s5] sm:$0xff] }
 0x627   : > { %1844 = vset.pattern.permute.xlu2 %v2060_v39 }
 0x640   : > { %v1057_v1 = vpop.permute.xlu1 %1056  ;;  %v1055_v30 = vpop.permute.xlu0 %1054 }
 0x641   : > { %v1063_v31 = vsel %vm1062_vm6, %v1055_v30, %v1057_v1 }
 0x642   : > { %v1067_v32 = vadd.f32 %v1063_v31, %v1036_v15  ;;  %v2064_v15 = vmov 25  }
 0x648   : > { %v1071_v33 = vpop.permute.xlu1 %1070 }
 0x649   : > { %v1077_v34 = vmul.f32 %v1071_v33, %v2274_v58  ;;  %v1078_v36 = vmul.f32 0.0, %v1071_v33  ;;  %v1142_v33 = vmul.f32 0.0, %v2487_v3 }
 0x64b   : > { %1085 = vrot.lane.b32.xlu0 %v1077_v34, %s2053_s22  ;;  %1087 = vrot.lane.b32.xlu1 %v1078_v36, %s2053_s22  ;;  %v2066_v34 = vmov 26  }
 0x653   : > { %1091 = vrot.lane.b32.xlu0 %v1080_v37, %s2053_s22  ;;  %1101 = vperm.xlu1 %1835, %v2523_v4  }
 0x65b   : > { %1837 = vset.pattern.permute.xlu1 %v2054_v47  ;;  %v2541_v47 = vpop.permute.xlu0 %1060 }
 0x671   : > { %v2528_v43 = vpop.permute.xlu2 %1182 }
 0x679   : > { %v2530_v46 = vpop.permute.xlu2 %1198 }
 0x67a   : > { %v1203_v44 = vmul.f32 %v2530_v46, %v2277_v7 }
 0x67c   : > { %1213 = vrot.lane.b32.xlu2 %v1203_v44, %s2061_s28 }
 0x684   : > { %1229 = vperm.xlu2 %1844, %v2538_v45  }
 0x68c   : > { %1846 = vset.pattern.permute.xlu2 %v2062_v59 }
 0x6bd   : > { %v1088_v51 = vpop.permute.xlu1 %1087  ;;  %v1086_v42 = vpop.permute.xlu0 %1085 }
 0x6be   : > { %v1094_v52 = vsel %vm1093_vm7, %v1086_v42, %v1088_v51 }
 0x6bf   : > { %v1098_v56 = vadd.f32 %v1094_v52, %v1067_v32 }
 0x6c5   : > { %v1102_v60 = vpop.permute.xlu1 %1101  ;;  %v2561_v54 = vpop.permute.xlu0 %1091 }
 0x6c6   : > { %v1108_v61 = vmul.f32 %v1102_v60, %v2274_v58  ;;  %v1109_v62 = vmul.f32 0.0, %v1102_v60 }
 0x6c8   : > { %1116 = vrot.lane.b32.xlu0 %v1108_v61, %s2055_s23  ;;  %1118 = vrot.lane.b32.xlu1 %v1109_v62, %s2055_s23  ;;  %v1173_v62 = vmul.f32 0.0, %v2506_v23  ;;  %v2071_v23 = vmov 29  }
 0x6d0   : > { %1122 = vrot.lane.b32.xlu0 %v1111_v5, %s2055_s23  ;;  %1132 = vperm.xlu1 %1837, %v2523_v4   ;;  %v2068_v5 = vmov 27  }
 0x6d6   : > { %v2551_v10 = vpop.permute.xlu2 %1213 }
 0x6d8   : > { %1839 = vset.pattern.permute.xlu1 %v2056_v63 }
 0x6de   : > { %v2554_v12 = vpop.permute.xlu2 %1229 }
 0x6df   : > { %v1234_v14 = vmul.f32 %v2554_v12, %v2277_v7 }
 0x6e1   : > { %1244 = vrot.lane.b32.xlu2 %v1234_v14, %s2063_s16  ;;  %v2069_v14 = vmov 28  }
 0x6e2   : > { %1854 = vset.pattern.permute.xlu0 %v2069_v14 }
 0x6e9   : > { %1260 = vperm.xlu2 %1846, %v2538_v45  }
 0x6f1   : > { %1848 = vset.pattern.permute.xlu2 %v2064_v15 }
 0x73a   : > { %v1119_v16 = vpop.permute.xlu1 %1118  ;;  %v1117_v48 = vpop.permute.xlu0 %1116 }
 0x73b   : > { %v1125_v63 = vsel %vm1124_vm8, %v1117_v48, %v1119_v16  ;;  %v2564_v18 = vpop.permute.xlu2 %1244 }
 0x73c   : > { %v1129_v19 = vadd.f32 %v1125_v63, %v1098_v56 }
 0x742   : > { %v1133_v28 = vpop.permute.xlu1 %1132  ;;  %v2587_v3 = vpop.permute.xlu0 %1122 }
 0x743   : > { %v1139_v1 = vmul.f32 %v1133_v28, %v2274_v58  ;;  %v1140_v30 = vmul.f32 0.0, %v1133_v28  ;;  %v2567_v31 = vpop.permute.xlu2 %1260 }
 0x744   : > { %v1265_v32 = vmul.f32 %v2567_v31, %v2277_v7 }
 0x745   : > { %1147 = vrot.lane.b32.xlu0 %v1139_v1, %s2057_s12  ;;  %1149 = vrot.lane.b32.xlu1 %v1140_v30, %s2057_s12 }
 0x746   : > { %1275 = vrot.lane.b32.xlu2 %v1265_v32, %s2065_s17 }
 0x74d   : > { %1153 = vrot.lane.b32.xlu0 %v1142_v33, %s2057_s12  ;;  %1163 = vperm.xlu1 %1839, %v2523_v4   ;;  %s1945_s12 = scalar_lea.hbm %s2822_s7, 32 }
 0x74e   : > { %1291 = vperm.xlu2 %1848, %v2538_v45  }
 0x755   : > { %1841 = vset.pattern.permute.xlu1 %v2058_v20 }
 0x756   : > { %1850 = vset.pattern.permute.xlu2 %v2066_v34 }
 0x7a0   : > { %v2580_v36 = vpop.permute.xlu2 %1275 }
 0x7a8   : > { %v2582_v37 = vpop.permute.xlu2 %1291 }
 0x7a9   : > { %v1296_v44 = vmul.f32 %v2582_v37, %v2277_v7 }
 0x7ab   : > { %1306 = vrot.lane.b32.xlu2 %v1296_v44, %s2067_s13 }
 0x7b3   : > { %1322 = vperm.xlu2 %1850, %v2538_v45  }
 0x7b7   : > { %v1150_v51 = vpop.permute.xlu1 %1149  ;;  %v1148_v20 = vpop.permute.xlu0 %1147 }
 0x7b8   : > { %v1156_v42 = vsel %vm1155_vm9, %v1148_v20, %v1150_v51  ;;  %v1204_v20 = vmul.f32 0.0, %v2530_v46 }
 0x7b9   : > { %v1160_v52 = vadd.f32 %v1156_v42, %v1129_v19  ;;  %v2072_v19 = vmov 30  }
 0x7bb   : > { %1852 = vset.pattern.permute.xlu2 %v2068_v5 }
 0x7bf   : > { %v1164_v56 = vpop.permute.xlu1 %1163 }
 0x7c0   : > { %v1170_v60 = vmul.f32 %v1164_v56, %v2274_v58  ;;  %v1171_v61 = vmul.f32 0.0, %v1164_v56 }
 0x7c2   : > { %1178 = vrot.lane.b32.xlu0 %v1170_v60, %s2059_s19  ;;  %1180 = vrot.lane.b32.xlu1 %v1171_v61, %s2059_s19 }
 0x7ca   : > { %1184 = vrot.lane.b32.xlu0 %v1173_v62, %s2059_s19  ;;  %1194 = vperm.xlu1 %1841, %v2523_v4  }
 0x7d2   : > { %1843 = vset.pattern.permute.xlu1 %v2060_v39  ;;  %v2610_v39 = vpop.permute.xlu0 %1153 }
 0x805   : > { %v2599_v16 = vpop.permute.xlu2 %1306 }
 0x80d   : > { %v2601_v48 = vpop.permute.xlu2 %1322 }
 0x80e   : > { %v1327_v63 = vmul.f32 %v2601_v48, %v2277_v7 }
 0x810   : > { %1337 = vrot.lane.b32.xlu2 %v1327_v63, %s2070_s18 }
 0x818   : > { %1353 = vperm.xlu2 %1852, %v2538_v45  }
 0x820   : > { %1853 = vset.pattern.permute.xlu2 %v2069_v14 }
 0x821   : > { %1380 = vperm.xlu2 %1853, %v2523_v4  }
 0x829   : > { %1856 = vset.pattern.permute.xlu2 %v2071_v23 }
 0x82a   : > { %1415 = vperm.xlu2 %1856, %v2538_v45  }
 0x832   : > { %1858 = vset.pattern.permute.xlu2 %v2072_v19 }
 0x833   : > { %1446 = vperm.xlu2 %1858, %v2538_v45  }
 0x834   : > { %v1181_v28 = vpop.permute.xlu1 %1180  ;;  %v1179_v1 = vpop.permute.xlu0 %1178 }
 0x835   : > { %v1187_v30 = vsel %vm1186_vm10, %v1179_v1, %v1181_v28 }
 0x836   : > { %v1191_v32 = vadd.f32 %v1187_v30, %v1160_v52  ;;  %v1235_v30 = vmul.f32 0.0, %v2554_v12  ;;  %v1266_v12 = vmul.f32 0.0, %v2567_v31  ;;  %v1297_v31 = vmul.f32 0.0, %v2582_v37 }
 0x837   : > { %v1328_v37 = vmul.f32 0.0, %v2601_v48 }
 0x83b   : > { %1859 = vset.pattern.permute.xlu2 %v2016_v0 }
 0x83c   : > { %v1195_v33 = vpop.permute.xlu1 %1194  ;;  %v2632_v61 = vpop.permute.xlu0 %1184 }
 0x83d   : > { %v1201_v44 = vmul.f32 %v1195_v33, %v2274_v58  ;;  %v1202_v51 = vmul.f32 0.0, %v1195_v33 }
 0x83f   : > { %1209 = vrot.lane.b32.xlu0 %v1201_v44, %s2061_s28  ;;  %1211 = vrot.lane.b32.xlu1 %v1202_v51, %s2061_s28 }
 0x847   : > { %1215 = vrot.lane.b32.xlu0 %v1204_v20, %s2061_s28  ;;  %1225 = vperm.xlu1 %1843, %v2523_v4  }
 0x84f   : > { %1845 = vset.pattern.permute.xlu1 %v2062_v59 }
 0x86a   : > { %v2623_v42 = vpop.permute.xlu2 %1337 }
 0x872   : > { %v2625_v52 = vpop.permute.xlu2 %1353 }
 0x873   : > { %v1358_v48 = vmul.f32 %v2625_v52, %v2277_v7 }
 0x87b   : > { %v2627_v56 = vpop.permute.xlu2 %1380 }
 0x87c   : > { %v1387_v60 = vmul.f32 %v2627_v56, %v2274_v58 }
 0x87e   : > { %1395 = vrot.lane.b32.xlu2 %v1387_v60, %s2073_s10 }
 0x8b1   : > { %v1212_v46 = vpop.permute.xlu1 %1211  ;;  %v1210_v62 = vpop.permute.xlu0 %1209 }
 0x8b2   : > { %v1218_v14 = vsel %vm1217_vm11, %v1210_v62, %v1212_v46 }
 0x8b3   : > { %v1222_v59 = vadd.f32 %v1218_v14, %v1191_v32 }
 0x8b9   : > { %v1226_v63 = vpop.permute.xlu1 %1225  ;;  %v2642_v33 = vpop.permute.xlu0 %1215 }
 0x8ba   : > { %v1232_v28 = vmul.f32 %v1226_v63, %v2274_v58  ;;  %v1233_v1 = vmul.f32 0.0, %v1226_v63 }
 0x8bc   : > { %1240 = vrot.lane.b32.xlu0 %v1232_v28, %s2063_s16  ;;  %1242 = vrot.lane.b32.xlu1 %v1233_v1, %s2063_s16 }
 0x8c4   : > { %1246 = vrot.lane.b32.xlu0 %v1235_v30, %s2063_s16  ;;  %1256 = vperm.xlu1 %1845, %v2523_v4   ;;  %s1662_s16 = sshll.u32 %s2003_s27, 4 }
 0x8cc   : > { %1847 = vset.pattern.permute.xlu1 %v2064_v15 }
 0x92e   : > { %v1243_v32 = vpop.permute.xlu1 %1242  ;;  %v1241_v44 = vpop.permute.xlu0 %1240 }
 0x92f   : > { %v1249_v51 = vsel %vm2827_vm12, %v1241_v44, %v1243_v32  ;;  %vm2828_vm12 = vcmask 850944  }
 0x930   : > { %v1253_v20 = vadd.f32 %v1249_v51, %v1222_v59 }
 0x936   : > { %v1257_v60 = vpop.permute.xlu1 %1256  ;;  %v2652_v15 = vpop.permute.xlu0 %1246 }
 0x937   : > { %v1263_v46 = vmul.f32 %v1257_v60, %v2274_v58  ;;  %v1264_v62 = vmul.f32 0.0, %v1257_v60 }
 0x939   : > { %1271 = vrot.lane.b32.xlu0 %v1263_v46, %s2065_s17  ;;  %1273 = vrot.lane.b32.xlu1 %v1264_v62, %s2065_s17 }
 0x941   : > { %1277 = vrot.lane.b32.xlu0 %v1266_v12, %s2065_s17  ;;  %1287 = vperm.xlu1 %1847, %v2523_v4  }
 0x949   : > { %1849 = vset.pattern.permute.xlu1 %v2066_v34 }
 0x9ab   : > { %v1274_v14 = vpop.permute.xlu1 %1273  ;;  %v1272_v59 = vpop.permute.xlu0 %1271 }
 0x9ac   : > { %v1280_v63 = vsel %vm2828_vm12, %v1272_v59, %v1274_v14  ;;  %vm2829_vm12 = vcmask 842752  }
 0x9ad   : > { %v1284_v28 = vadd.f32 %v1280_v63, %v1253_v20 }
 0x9b3   : > { %v1288_v1 = vpop.permute.xlu1 %1287  ;;  %v2662_v34 = vpop.permute.xlu0 %1277 }
 0x9b4   : > { %v1294_v30 = vmul.f32 %v1288_v1, %v2274_v58  ;;  %v1295_v32 = vmul.f32 0.0, %v1288_v1 }
 0x9b6   : > { %1302 = vrot.lane.b32.xlu0 %v1294_v30, %s2067_s13  ;;  %1304 = vrot.lane.b32.xlu1 %v1295_v32, %s2067_s13 }
 0x9be   : > { %1308 = vrot.lane.b32.xlu0 %v1297_v31, %s2067_s13  ;;  %1318 = vperm.xlu1 %1849, %v2523_v4   ;;  %v1359_v31 = vmul.f32 0.0, %v2625_v52  ;;  %v1416_v52 = vpop.permute.xlu2 %1415 }
 0x9c6   : > { %1851 = vset.pattern.permute.xlu1 %v2068_v5 }
 0xa28   : > { %v1305_v44 = vpop.permute.xlu1 %1304  ;;  %v1303_v51 = vpop.permute.xlu0 %1302 }
 0xa29   : > { %v1311_v20 = vsel %vm2829_vm12, %v1303_v51, %v1305_v44  ;;  %vm2830_vm12 = vcmask 834560  }
 0xa2a   : > { %v1315_v60 = vadd.f32 %v1311_v20, %v1284_v28 }
 0xa30   : > { %v1319_v46 = vpop.permute.xlu1 %1318  ;;  %v2672_v5 = vpop.permute.xlu0 %1308 }
 0xa31   : > { %v1325_v62 = vmul.f32 %v1319_v46, %v2274_v58  ;;  %v1326_v12 = vmul.f32 0.0, %v1319_v46 }
 0xa33   : > { %1335 = vrot.lane.b32.xlu1 %v1326_v12, %s2070_s18  ;;  %1333 = vrot.lane.b32.xlu0 %v1325_v62, %s2070_s18  ;;  %v1421_v62 = vmul.f32 0.0, %v1416_v52 }
 0xa3b   : > { %1349 = vperm.xlu1 %1851, %v2523_v4   ;;  %1339 = vrot.lane.b32.xlu0 %v1328_v37, %s2070_s18  ;;  %v1420_v37 = vmul.f32 %v1416_v52, %v2277_v7  ;;  %s1505_s18 = scalar_lea.hbm %s2822_s7, %s1662_s16 }
 0xa3c   : > { %s1508_s27 = sshll.u32 %s1505_s18, 4  ;;  %s1509_s27 = int_to_ptr.hbm [resolvable:$true] %s1508_s27 }
 0xa43   : > { %1855 = vset.pattern.permute.xlu1 %v2071_v23  ;;  %v1388_v23 = vmul.f32 0.0, %v2627_v56 }
 0xaa5   : > { %v1336_v14 = vpop.permute.xlu1 %1335  ;;  %v1334_v59 = vpop.permute.xlu0 %1333 }
 0xaa6   : > { %v1342_v63 = vsel %vm2830_vm12, %v1334_v59, %v1336_v14  ;;  %vm1372_vm12 = vcmask 826368   ;;  %v1447_v14 = vpop.permute.xlu2 %1446 }
 0xaa7   : > { %v1346_v28 = vadd.f32 %v1342_v63, %v1315_v60 }
 0xaad   : > { %v1350_v1 = vpop.permute.xlu1 %1349  ;;  %v2686_v44 = vpop.permute.xlu0 %1339 }
 0xaae   : > { %v1356_v30 = vmul.f32 %v1350_v1, %v2274_v58  ;;  %v1357_v32 = vmul.f32 0.0, %v1350_v1 }
 0xab0   : > { %1366 = vrot.lane.b32.xlu1 %v1357_v32, %s2074_s20  ;;  %1364 = vrot.lane.b32.xlu0 %v1356_v30, %s2074_s20  ;;  %v1473_v30 = vld [vmem:[%s2821_s6 + $0x8] sm:$0xff]  ;;  %v1452_v32 = vmul.f32 0.0, %v1447_v14 }
 0xab8   : > { %1411 = vperm.xlu1 %1855, %v2523_v4   ;;  %1384 = vperm.xlu0 %1854, %v2538_v45  }
 0xac0   : > { %1857 = vset.pattern.permute.xlu1 %v2072_v19  ;;  %1368 = vrot.lane.b32.xlu0 %v1358_v48, %s2074_s20  ;;  %v1472_v48 = vld [vmem:[%s2821_s6] sm:$0xff] }
 0xac1   : > { %1442 = vperm.xlu1 %1857, %v2523_v4   ;;  %1860 = vset.pattern.permute.xlu0 %v2016_v0 }
 0xac8   : > { %1397 = vrot.lane.b32.xlu0 %v1388_v23, %s2073_s10  ;;  %v1396_v23 = vpop.permute.xlu2 %1395 }
 0xac9   : > { %1370 = vrot.lane.b32.xlu1 %v1359_v31, %s2074_s20 }
 0xb22   : > { %v1367_v45 = vpop.permute.xlu1 %1366  ;;  %v1365_v51 = vpop.permute.xlu0 %1364 }
 0xb23   : > { %v1373_v20 = vsel %vm1372_vm12, %v1365_v51, %v1367_v45  ;;  %v847_v51 = vsel %vm845_vm15, %v2364_v8, %v2397_v41  ;;  %v971_v8 = vsel %vm969_vm3, %v2408_v53, %v2467_v49  ;;  %v1095_v53 = vsel %vm1093_vm7, %v2469_v50, %v2561_v54 }
 0xb24   : > { %v2689_v19 = vadd.f32 %v1373_v20, %v1346_v28  ;;  %v1451_v28 = vmul.f32 %v1447_v14, %v2277_v7  ;;  %v1219_v54 = vsel %vm1217_vm11, %v2551_v10, %v2642_v33  ;;  %vm1434_vm15 = vcmask 809984  }
 0xb25   : > { %vm2846_vm3 = vcmask 834560  }
 0xb2a   : > { %v1412_v60 = vpop.permute.xlu1 %1411  ;;  %v1385_v4 = vpop.permute.xlu0 %1384 }
 0xb2b   : > { %v1418_v0 = vmul.f32 %v1412_v60, %v2274_v58  ;;  %v1389_v56 = vmul.f32 %v1385_v4, %v2277_v7  ;;  %v1390_v46 = vmul.f32 0.0, %v1385_v4  ;;  %v1419_v12 = vmul.f32 0.0, %v1412_v60 }
 0xb2c   : > { %v816_v7 = vsel %vm814_vm14, %v2353_v55, %v2382_v24  ;;  %v878_v60 = vsel %vm876_vm0, %v2377_v21, %v2416_v57  ;;  %v1002_v21 = vsel %vm1000_vm4, %v2424_v9, %v2493_v6  ;;  %v1033_v57 = vsel %vm1031_vm5, %v2440_v25, %v2512_v27 }
 0xb2d   : > { %1426 = vrot.lane.b32.xlu0 %v1418_v0, %s2075_s21  ;;  %1399 = vrot.lane.b32.xlu1 %v1389_v56, %s2073_s10  ;;  %v1126_v6 = vsel %vm1124_vm8, %v2485_v2, %v2587_v3  ;;  %v1157_v27 = vsel %vm1155_vm9, %v2504_v22, %v2610_v39  ;;  %vm2843_vm14 = vcmask 859136   ;;  %vm2844_vm0 = vcmask 850944  }
 0xb2e   : > { %1401 = vrot.lane.b32.xlu2 %v1390_v46, %s2073_s10  ;;  %v1250_v3 = vsel %vm2843_vm14, %v2564_v18, %v2652_v15  ;;  %v1343_v15 = vsel %vm2846_vm3, %v2623_v42, %v2686_v44  ;;  %s386_s10 = scalar_lea.vmem [#allocation8], %s1649_s8 }
 0xb2f   : > { %s1506_s20 = sshll.u32 %s386_s10, 4  ;;  %s1507_s20 = int_to_ptr.vmem [resolvable:$true] %s1506_s20 }
 0xb32   : > { %v1369_v45 = vpop.permute.xlu0 %1368 }
 0xb33   : > { %v1443_v59 = vpop.permute.xlu1 %1442 }
 0xb34   : > { %v1450_v63 = vmul.f32 0.0, %v1443_v59  ;;  %v1449_v1 = vmul.f32 %v1443_v59, %v2274_v58  ;;  %v785_v58 = vsel %vm783_vm13, %v2328_v17, %v2369_v11  ;;  %v909_v17 = vsel %vm907_vm1, %v2388_v35, %v2432_v13 }
 0xb35   : > { %1432 = vrot.lane.b32.xlu0 %v1421_v62, %s2075_s21  ;;  %1428 = vrot.lane.b32.xlu1 %v1419_v12, %s2075_s21  ;;  %v789_v31 = vadd.f32 %v785_v58, %v2333_v26  ;;  %v940_v26 = vsel %vm938_vm2, %v2395_v40, %v2448_v29  ;;  %v1064_v13 = vsel %vm1062_vm6, %v2458_v38, %v2541_v47  ;;  %vm1403_vm13 = vcmask 818176  }
 0xb36   : > { %1430 = vrot.lane.b32.xlu2 %v1420_v37, %s2075_s21  ;;  %v1188_v47 = vsel %vm1186_vm10, %v2528_v43, %v2632_v61  ;;  %v1281_v43 = vsel %vm2844_vm0, %v2580_v36, %v2662_v34  ;;  %vm2845_vm1 = vcmask 842752   ;;  %vm1465_vm2 = vcmask 801792   ;;  %s1493_s21 = scalar_lea.sflag [#allocation5], %s2209_s30 }
 0xb37   : > { %v820_v20 = vadd.f32 %v816_v7, %v789_v31  ;;  %v1312_v10 = vsel %vm2845_vm1, %v2599_v16, %v2672_v5 }
 0xb39   : > { %v851_v4 = vadd.f32 %v847_v51, %v820_v20 }
 0xb3a   : > { %v1398_v0 = vpop.permute.xlu0 %1397 }
 0xb3b   : > { %v882_v11 = vadd.f32 %v878_v60, %v851_v4  ;;  %v1371_v56 = vpop.permute.xlu1 %1370  ;;  %v1404_v61 = vsel %vm1403_vm13, %v1396_v23, %v1398_v0  ;;  %v1487_v60 = vld [vmem:[%s395_s15 + $0x8] sm:$0xff] }
 0xb3c   : > { %v1408_v18 = vadd.f32 %v1404_v61, %v2689_v19  ;;  %v1374_v16 = vsel %vm1372_vm12, %v1369_v45, %v1371_v56 }
 0xb3d   : > { %1461 = vrot.lane.b32.xlu0 %v1451_v28, %s2076_s11  ;;  %1457 = vrot.lane.b32.xlu1 %v1449_v1, %s2076_s11  ;;  %v913_v24 = vadd.f32 %v909_v17, %v882_v11 }
 0xb3e   : > { %1459 = vrot.lane.b32.xlu2 %v1450_v63, %s2076_s11 }
 0xb3f   : > { %v944_v41 = vadd.f32 %v940_v26, %v913_v24 }
 0xb41   : > { %v975_v35 = vadd.f32 %v971_v8, %v944_v41 }
 0xb43   : > { %v1006_v40 = vadd.f32 %v1002_v21, %v975_v35 }
 0xb45   : > { %1463 = vrot.lane.b32.xlu1 %v1452_v32, %s2076_s11  ;;  %1481 = vperm.xlu0 %1860, %v1473_v30   ;;  %v1037_v29 = vadd.f32 %v1033_v57, %v1006_v40  ;;  %v1486_v32 = vld [vmem:[%s395_s15] sm:$0xff]  ;;  %s1939_s11 = sshra.s32 %s1509_s27, 4  ;;  %s1940_s11 = int_to_ptr.hbm [resolvable:$true] %s1939_s11 }
 0xb46   : > { %1476 = vperm.xlu2 %1859, %v1472_v48   ;;  %s1941_s22 = scalar_lea.hbm %s1940_s11, 16  ;;  %p1946_p8 = scmp.lt.s32.totalorder %s1940_s11, %s2822_s7 }
 0xb47   : > { %v1068_v46 = vadd.f32 %v1064_v13, %v1037_v29  ;;  %p1942_p5 = scmp.ne.s32.totalorder %s1940_s11, %s1941_s22  ;;  %p1947_p10 = scmp.lt.s32.totalorder %s1945_s12, %s1941_s22 }
 0xb49   : > { %v1099_v25 = vadd.f32 %v1095_v53, %v1068_v46  ;;  %p1943_p6 = pnand %p1942_p5, %p2170_p9  ;;  %p1948_p13 = por %p1947_p10, %p1946_p8 }
 0xb4b   : > { %v1130_v38 = vadd.f32 %v1126_v6, %v1099_v25  ;;  %p1944_p7 = pneg %p1943_p6 }
 0xb4d   : > { %v1161_v50 = vadd.f32 %v1157_v27, %v1130_v38  ;;  %p1949_p0 = pnand %p1948_p13, %p1944_p7 }
 0xb4f   : > { %v1192_v62 = vadd.f32 %v1188_v47, %v1161_v50 }
 0xb51   : > { %v1223_v39 = vadd.f32 %v1219_v54, %v1192_v62 }
 0xb53   : > { %v1254_v37 = vadd.f32 %v1250_v3, %v1223_v39 }
 0xb55   : > { %v1285_v14 = vadd.f32 %v1281_v43, %v1254_v37 }
 0xb57   : > { %v1316_v36 = vadd.f32 %v1312_v10, %v1285_v14 }
 0xb59   : > { %v1347_v28 = vadd.f32 %v1343_v15, %v1316_v36 }
 0xb5b   : > { %v1378_v42 = vadd.f32 %v1374_v16, %v1347_v28 }
 0xb88   : > { %v1402_v55 = vpop.permute.xlu2 %1401 }
 0xb90   : > { %v1431_v49 = vpop.permute.xlu2 %1430 }
 0xb98   : > { %v1460_v22 = vpop.permute.xlu2 %1459 }
 0xb9f   : > { %v1400_v52 = vpop.permute.xlu1 %1399  ;;  %v1427_v9 = vpop.permute.xlu0 %1426 }
 0xba0   : > { %v1477_v19 = vpop.permute.xlu2 %1476  ;;  %v1405_v30 = vsel %vm1403_vm13, %v1400_v52, %v1402_v55 }
 0xba1   : > { %v1409_v58 = vadd.f32 %v1405_v30, %v1378_v42 }
 0xba7   : > { %v1429_v12 = vpop.permute.xlu1 %1428  ;;  %v1433_v2 = vpop.permute.xlu0 %1432 }
 0xba8   : > { %v1435_v33 = vsel %vm1434_vm15, %v1427_v9, %v1429_v12  ;;  %v1436_v48 = vsel %vm1434_vm15, %v1431_v49, %v1433_v2 }
 0xba9   : > { %v1439_v34 = vadd.f32 %v1435_v33, %v1408_v18  ;;  %v1440_v23 = vadd.f32 %v1436_v48, %v1409_v58 }
 0xbaf   : > { %v1458_v59 = vpop.permute.xlu1 %1457  ;;  %v1462_v63 = vpop.permute.xlu0 %1461 }
 0xbb0   : > { %v1466_v5 = vsel %vm1465_vm2, %v1458_v59, %v1460_v22 }
 0xbb1   : > { %v1470_v1 = vadd.f32 %v1466_v5, %v1439_v34 }
 0xbb3   : > { %v1484_v44 = vadd.f32 %v1477_v19, %v1470_v1 }
 0xbb5   : > { %v1488_v7 = vmul.f32 %v1486_v32, %v1484_v44 }
 0xbb7   : > { %1490 = vst [vmem:[%s386_s10] sm:$0xff] %v1488_v7  ;;  %v1464_v31 = vpop.permute.xlu1 %1463  ;;  %v1482_v51 = vpop.permute.xlu0 %1481 }
 0xbb8   : > { %v1467_v45 = vsel %vm1465_vm2, %v1462_v63, %v1464_v31 }
 0xbb9   : > { %v1471_v20 = vadd.f32 %v1467_v45, %v1440_v23 }
 0xbbb   : > { %v1485_v4 = vadd.f32 %v1482_v51, %v1471_v20 }
 0xbbd   : > { %v1489_v17 = vmul.f32 %v1487_v60, %v1485_v4 }
 0xbbf   : > { %1491 = vst [vmem:[%s386_s10 + $0x8] sm:$0xff] %v1489_v17 }
 0xbc0   : > { %1952 = shalt.err (!%p1949_p0)
}
 0xbc1   : > { %s2077_s30 = smov 128   ;;  %s2078_s26 = smov 8  }
 0xbc2   : > { %1667 = dma.vmem_to_hbm [thread:$0]  (%p2170_p9), %s1507_s20, 256, %s1509_s27, %s1493_s21, %s2077_s30, %s2077_s30, %s2078_s26  }
 0xbc3 PF: > { %s1523_s9 = sand.u32 1, %s1991_s24   ;;  %p1677_p1 = pnand %p1641_p12, %p2177_p11 }
 0xbc4   : > { %s1524_s15 = scalar_lea.sflag [#allocation5], %s1523_s9 }
 0xbc5   : > { %p1678_p2 = pneg %p1677_p1 }
 0xbc7   : > { %1986 = dma.done.wait (%p1678_p2), %s1524_s15, 256  }
 0xbc8   : > { %1988 = vsyncadd (%p1678_p2), %s1524_s15, 4294967040  ;;  %s26_s29 = sadd.s32 1, %s2011_s29   ;;  %s2848_s16 = sld [smem:[#allocation12_spill]] }
 0xbc9   : > { %p23_p3 = scmp.ge.s32.totalorder %s26_s29, 4   ;;  %s2849_s26 = sld [smem:[#allocation15_spill]] }
 0xbca   : > { %s2850_s27 = sld [smem:[#allocation13_spill]]  ;;  %s2852_s24 = smov %s1995_s25 }
 0xbcb   : > { %s2851_s28 = sld [smem:[#allocation14_spill]]  ;;  %25 = sbr.rel (!%p23_p3) target bundleno = 10 (0xa), region = 109 }
 0xbce   : > { %s2853_s25 = smov %s2848_s16 }
 0xbd0   :  { %1530 = vsyncpa [#allocation4], 1 }
 0xbd1   :  { %1532 = vsyncpa [#allocation4 + $0x1], 1 }
 0xbd2   :  { %1533 = vsyncpa [#allocation7], 1 }
 0xbd3   :  { %1535 = vsyncpa [#allocation7 + $0x1], 1 }
 0xbd4   :  { %1536 = vsyncpa [#allocation5], 1 }
 0xbd5   :  { %1538 = vsyncpa [#allocation5 + $0x1], 1 }

</bundles_post_ra>
